<compile_context>
chip_gen: v7x
topology: tpu7x:2x2x1
jax: 0.10.0
libtpu: 0.0.40
codegen_flags: <defaults>
</compile_context>

<pallas_src>
import numpy as np
import jax
import jax.numpy as jnp
from jax.experimental import pallas as pl
from jax.experimental.pallas import tpu as pltpu


def _round_up(x, m):
    return ((x + m - 1) // m) * m


# --------------------------------------------------------------------------------------
# Pallas kernel
# --------------------------------------------------------------------------------------
def build_kernel(cin_specs, num_deep, split_half, compute_dtype):
    """cin_specs: list of static (hp_k, out_k) per CIN layer (unpadded sizes)."""
    num_cin = len(cin_specs)

    def kernel(*refs):
        out_ref = refs[-1]                       # (B, 1)
        ins = refs[:-1]
        emb_ref, x0_ref, wlin_ref, bout_ref = ins[0], ins[1], ins[2], ins[3]
        p = 4
        cin_refs = [(ins[p + 3 * k], ins[p + 3 * k + 1], ins[p + 3 * k + 2])
                    for k in range(num_cin)]
        p += 3 * num_cin
        deep_refs = [(ins[p + 4 * i], ins[p + 4 * i + 1],
                      ins[p + 4 * i + 2], ins[p + 4 * i + 3])
                     for i in range(num_deep)]
        p += 4 * num_deep
        wout_deep_ref = ins[p]

        emb_flat = emb_ref[...]                  # (B, F*E)
        x0 = x0_ref[...]                         # (E*B, F), rows ordered (e, b)
        B = emb_flat.shape[0]
        E = x0.shape[0] // B

        # ----- linear part, folded into the head (wlin pre-scaled by wout[0]) -----
        logit = bout_ref[...] + jnp.sum(emb_flat * wlin_ref[...],
                                        axis=1, keepdims=True)          # (B, 1)

        # ----- CIN (compressed interaction network), Z-free formulation -----
        x0m = x0.astype(compute_dtype)
        x_prev = x0                              # (E*B, Hp), starts with Hp = F
        for k, (hp, out) in enumerate(cin_specs):
            w_ref, b_ref, wo_ref = cin_refs[k]   # loaded at point of use
            Wp = w_ref[...]                      # (F, hp*out_p), column-padded per h
            out_p = Wp.shape[1] // hp
            # One lane-dense MXU matmul per layer (x0 factored out of Z).
            P = jnp.dot(x0m, Wp, preferred_element_type=jnp.float32)    # (E*B, hp*out_p)
            # VPU reduction over the x_prev channel h (replaces the Z buffer entirely).
            # TODO(synk): at production Hp (~100) switch to lax.fori_loop w/ small unroll.
            acc = x_prev[:, 0:1] * P[:, 0:out_p]
            for h in range(1, hp):
                acc = acc + x_prev[:, h:h + 1] * P[:, h * out_p:(h + 1) * out_p]
            xk = jnp.maximum(acc + b_ref[...], 0.0)      # (E*B, out_p); padded cols == 0
            if split_half and k != num_cin - 1:
                half = out // 2
                x_prev = xk[:, :half]
                hi = xk[:, half:out]
            else:
                x_prev = xk[:, :out]
                hi = xk[:, :out]
            # torch.sum over the embedding dim: rows are (e, b) -> E slice-adds on the
            # value itself (no VMEM round-trip).
            r = hi[0:B, :]
            for e in range(1, E):
                r = r + hi[e * B:(e + 1) * B, :]
            logit = logit + jnp.sum(r * wo_ref[...], axis=1, keepdims=True)

        # ----- deep part: Linear -> BatchNorm1d (training-mode stats) -> ReLU -----
        y = emb_flat
        for i in range(num_deep):
            w_ref, b_ref, g_ref, bt_ref = deep_refs[i]   # loaded at point of use
            W = w_ref[...]
            y = jnp.dot(y.astype(compute_dtype), W,
                        preferred_element_type=jnp.float32) + b_ref[...]
            mean = jnp.mean(y, axis=0, keepdims=True)
            var = jnp.mean(jnp.square(y - mean), axis=0, keepdims=True)
            y = (y - mean) * jax.lax.rsqrt(var + 1e-5) * g_ref[...] + bt_ref[...]
            y = jnp.maximum(y, 0.0)

        # ----- output head tail: deep segment (padded cols of wout_deep are zero) -----
        logit = logit + jnp.sum(y * wout_deep_ref[...], axis=1, keepdims=True)
        out_ref[...] = jax.nn.sigmoid(logit)

    return kernel


# --------------------------------------------------------------------------------------
# Wrapper (glue: embedding gather, layout, parameter repacking / lane padding)
# --------------------------------------------------------------------------------------
def xdeepfm_forward(feat_index, feat_value, params, field_size, embedding_size,
                    split_half, compute_dtype=jnp.float32):
    del feat_value  # unused by the original PyTorch forward as well
    f32 = jnp.float32
    emb = params["emb_table"][feat_index].astype(f32)           # (B, F, E)
    B, F, E = emb.shape
    emb_flat = emb.reshape(B, F * E)                            # (B, F*E)
    x0 = jnp.transpose(emb, (2, 0, 1)).reshape(E * B, F)        # (E*B, F), rows (e, b)

    wout = params["wout"]                                       # (1 + fc + D_last, 1)
    # Fold the linear term into the head: pre-scale wlin by wout[0], fold blin into bias.
    wlin_row = (params["wlin"][:, 0] * wout[0, 0]).reshape(1, F * E)
    bout_eff = params["bout"] + wout[0:1, 0:1] * params["blin"]  # (1, 1)

    inputs = [emb_flat, x0, wlin_row, bout_eff]

    # ---- CIN params: repack conv1d weight (Hp*F, out) -> (F, Hp*out_p), pad out->128 ----
    cin_specs = []
    prev = F
    off = 1
    n_cin = len(params["cin"])
    for k, (w, b) in enumerate(params["cin"]):
        out = w.shape[1]
        hp = prev
        out_p = _round_up(out, 128)
        w3 = w.reshape(hp, F, out).transpose(1, 0, 2)            # (F, hp, out)
        wp = jnp.zeros((F, hp, out_p), f32).at[:, :, :out].set(w3).reshape(F, hp * out_p)
        bp = jnp.zeros((1, out_p), f32).at[:, :out].set(b)
        if split_half and k != n_cin - 1:
            half = out // 2
            hw = out - half
            prev = half
        else:
            hw = out
            prev = out
        wo = wout[off:off + hw, 0].reshape(1, hw)
        off += hw
        inputs += [wp.astype(compute_dtype), bp, wo]
        cin_specs.append((hp, out))

    # ---- deep params: zero-pad widths to multiples of 128 (BN on padded cols is 0) ----
    prev_pad = F * E
    for (w, bb, g, bt) in params["deep"]:
        din, dout = w.shape
        dout_p = _round_up(dout, 128)
        wp = jnp.zeros((prev_pad, dout_p), f32).at[:din, :dout].set(w)
        bp = jnp.zeros((1, dout_p), f32).at[:, :dout].set(bb)
        gp = jnp.zeros((1, dout_p), f32).at[:, :dout].set(g)
        btp = jnp.zeros((1, dout_p), f32).at[:, :dout].set(bt)
        inputs += [wp.astype(compute_dtype), bp, gp, btp]
        prev_pad = dout_p

    d_last = wout.shape[0] - off
    dp_last = _round_up(d_last, 128)
    wout_deep = jnp.zeros((1, dp_last), f32).at[0, :d_last].set(wout[off:, 0])
    inputs.append(wout_deep)

    kernel = build_kernel(cin_specs, len(params["deep"]), split_half, compute_dtype)
    vmem = pl.BlockSpec(memory_space=pltpu.MemorySpace.VMEM)
    # TODO(synk): no batch grid — training-mode BatchNorm needs whole-batch stats per
    # deep layer; a batch grid requires a multi-pass grid with global sum/sumsq scratch.
    return pl.pallas_call(
        kernel,
        out_shape=jax.ShapeDtypeStruct((B, 1), jnp.float32),
        in_specs=[vmem] * len(inputs),
        out_specs=vmem,
        compiler_params=pltpu.CompilerParams(vmem_limit_bytes=32 * 1024 * 1024),
    )(*inputs)


# --------------------------------------------------------------------------------------
# Pure-JAX reference (independent implementation mirroring the PyTorch code)
# --------------------------------------------------------------------------------------
def reference_forward(feat_index, params, split_half):
    emb = params["emb_table"][feat_index]
    B, F, E = emb.shape
    emb_flat = emb.reshape(B, F * E)
    linear_part = emb_flat @ params["wlin"] + params["blin"]
    x0 = emb
    x_prev = x0
    res = []
    n = len(params["cin"])
    for k, (W, b) in enumerate(params["cin"]):
        z = jnp.einsum("bhd,bmd->bhmd", x_prev, x0).reshape(B, -1, E)
        xk = jnp.einsum("bcd,co->bod", z, W) + b.reshape(1, -1, 1)
        xk = jnp.maximum(xk, 0.0)
        if split_half and k != n - 1:
            half = xk.shape[1] // 2
            x_prev, hi = xk[:, :half, :], xk[:, half:, :]
        else:
            x_prev, hi = xk, xk
        res.append(hi)
    res = jnp.concatenate(res, axis=1).sum(axis=2)
    y = emb_flat
    for (W, b, g, bt) in params["deep"]:
        y = y @ W + b
        mean = y.mean(axis=0, keepdims=True)
        var = jnp.mean((y - mean) ** 2, axis=0, keepdims=True)
        y = (y - mean) / jnp.sqrt(var + 1e-5) * g + bt
        y = jnp.maximum(y, 0.0)
    concat = jnp.concatenate([linear_part, res, y], axis=1)
    return jax.nn.sigmoid(concat @ params["wout"] + params["bout"])


# --------------------------------------------------------------------------------------
# Deterministic parameter init (shapes follow xDeepFM.__init__)
# --------------------------------------------------------------------------------------
def init_params(key, feature_size, field_size, embedding_size, cin_layer_sizes,
                deep_layer_sizes, split_half):
    keys = iter(jax.random.split(key, 32))

    def xavier(k, shape):
        limit = (6.0 / (shape[0] + shape[1])) ** 0.5
        return jax.random.uniform(k, shape, jnp.float32, -limit, limit)

    F, E = field_size, embedding_size
    d_in = F * E
    emb_table = xavier(next(keys), (feature_size, E))
    wlin = xavier(next(keys), (d_in, 1))
    blin = jnp.zeros((1, 1), jnp.float32)

    cin, prev, fc = [], F, 0
    n = len(cin_layer_sizes)
    for k, out in enumerate(cin_layer_sizes):
        in_ch = F * prev
        cin.append((xavier(next(keys), (in_ch, out)), jnp.zeros((1, out), jnp.float32)))
        prev = out // 2 if (split_half and k != n - 1) else out
        fc += prev

    deep = []
    dims = [d_in] + list(deep_layer_sizes)
    for i in range(len(deep_layer_sizes)):
        w = xavier(next(keys), (dims[i], dims[i + 1]))
        b = 0.01 * jax.random.normal(next(keys), (1, dims[i + 1]), jnp.float32)
        g = jnp.ones((1, dims[i + 1]), jnp.float32)
        bt = jnp.zeros((1, dims[i + 1]), jnp.float32)
        deep.append((w, b, g, bt))

    concat_dim = 1 + fc + deep_layer_sizes[-1]
    wout = xavier(next(keys), (concat_dim, 1))
    bout = jnp.zeros((1, 1), jnp.float32)
    return dict(emb_table=emb_table, wlin=wlin, blin=blin, cin=cin, deep=deep,
                wout=wout, bout=bout)


# --------------------------------------------------------------------------------------
if __name__ == "__main__":
    feature_size = 64
    field_size = 8
    embedding_size = 8
    cin_layer_sizes = [16, 16, 8]
    deep_layer_sizes = [32, 32]
    split_half = True
    batch = 4

    key = jax.random.PRNGKey(0)
    kp, kidx, kval = jax.random.split(key, 3)
    params = init_params(kp, feature_size, field_size, embedding_size,
                         cin_layer_sizes, deep_layer_sizes, split_half)

    feat_index = jax.random.randint(kidx, (batch, field_size), 0, feature_size)
    feat_value = jax.random.uniform(kval, (batch, field_size), jnp.float32)  # unused

    # compute_dtype=jnp.bfloat16 is a valid knob on v6e/v7x (f32 accumulation kept);
    # default f32 for exact parity with the f32 reference below.
    out = xdeepfm_forward(feat_index, feat_value, params, field_size,
                          embedding_size, split_half, compute_dtype=jnp.float32)
    out = jax.block_until_ready(out)

    ref = reference_forward(feat_index, params, split_half)
    assert out.shape == (batch, 1)
    np.testing.assert_allclose(np.asarray(out), np.asarray(ref), rtol=1e-3, atol=1e-3)
    print("KERNEL_OK")
</pallas_src>

<mosaic_0001>
module attributes {stable_mosaic.version = 11 : i64} {
  func.func @kernel(%arg0: memref<4x64xf32, #tpu.memory_space<vmem>>, %arg1: memref<32x8xf32, #tpu.memory_space<vmem>>, %arg2: memref<1x64xf32, #tpu.memory_space<vmem>>, %arg3: memref<1x1xf32, #tpu.memory_space<vmem>>, %arg4: memref<8x1024xf32, #tpu.memory_space<vmem>>, %arg5: memref<1x128xf32, #tpu.memory_space<vmem>>, %arg6: memref<1x8xf32, #tpu.memory_space<vmem>>, %arg7: memref<8x1024xf32, #tpu.memory_space<vmem>>, %arg8: memref<1x128xf32, #tpu.memory_space<vmem>>, %arg9: memref<1x8xf32, #tpu.memory_space<vmem>>, %arg10: memref<8x1024xf32, #tpu.memory_space<vmem>>, %arg11: memref<1x128xf32, #tpu.memory_space<vmem>>, %arg12: memref<1x8xf32, #tpu.memory_space<vmem>>, %arg13: memref<64x128xf32, #tpu.memory_space<vmem>>, %arg14: memref<1x128xf32, #tpu.memory_space<vmem>>, %arg15: memref<1x128xf32, #tpu.memory_space<vmem>>, %arg16: memref<1x128xf32, #tpu.memory_space<vmem>>, %arg17: memref<128x128xf32, #tpu.memory_space<vmem>>, %arg18: memref<1x128xf32, #tpu.memory_space<vmem>>, %arg19: memref<1x128xf32, #tpu.memory_space<vmem>>, %arg20: memref<1x128xf32, #tpu.memory_space<vmem>>, %arg21: memref<1x128xf32, #tpu.memory_space<vmem>>, %arg22: memref<4x1xf32, #tpu.memory_space<vmem>>) attributes {dimension_semantics = [], scalar_prefetch = 0 : i64, scratch_operands = 0 : i64, tpu.core_type = #tpu.core_type<tc>} {
    %c0 = arith.constant 0 : index
    %c0_0 = arith.constant 0 : index
    %0 = vector.load %arg0[%c0, %c0_0] : memref<4x64xf32, #tpu.memory_space<vmem>>, vector<4x64xf32>
    %c0_1 = arith.constant 0 : index
    %c0_2 = arith.constant 0 : index
    %1 = vector.load %arg1[%c0_1, %c0_2] : memref<32x8xf32, #tpu.memory_space<vmem>>, vector<32x8xf32>
    %c0_3 = arith.constant 0 : index
    %c0_4 = arith.constant 0 : index
    %2 = vector.load %arg3[%c0_3, %c0_4] : memref<1x1xf32, #tpu.memory_space<vmem>>, vector<1x1xf32>
    %c0_5 = arith.constant 0 : index
    %c0_6 = arith.constant 0 : index
    %3 = vector.load %arg2[%c0_5, %c0_6] : memref<1x64xf32, #tpu.memory_space<vmem>>, vector<1x64xf32>
    %4 = vector.broadcast %3 : vector<1x64xf32> to vector<4x64xf32>
    %5 = arith.mulf %0, %4 : vector<4x64xf32>
    %cst = arith.constant dense<0.000000e+00> : vector<4xf32>
    %6 = vector.multi_reduction <add>, %5, %cst [1] : vector<4x64xf32> to vector<4xf32>
    %7 = vector.shape_cast %6 : vector<4xf32> to vector<4x1xf32>
    %8 = vector.broadcast %2 : vector<1x1xf32> to vector<4x1xf32>
    %9 = arith.addf %8, %7 : vector<4x1xf32>
    %c0_7 = arith.constant 0 : index
    %c0_8 = arith.constant 0 : index
    %10 = vector.load %arg4[%c0_7, %c0_8] : memref<8x1024xf32, #tpu.memory_space<vmem>>, vector<8x1024xf32>
    %cst_9 = arith.constant dense<0.000000e+00> : vector<32x1024xf32>
    %11 = tpu.matmul %1, %10, %cst_9 {dimension_numbers = #tpu.dot_dimension_numbers<[1], [0], [0], [1], [0, 0, 1, 1], [], []>} : vector<32x8xf32>, vector<8x1024xf32>, vector<32x1024xf32> -> vector<32x1024xf32>
    %12 = vector.extract_strided_slice %1 {offsets = [0, 0], sizes = [32, 1], strides = [1, 1]} : vector<32x8xf32> to vector<32x1xf32>
    %13 = vector.extract_strided_slice %11 {offsets = [0, 0], sizes = [32, 128], strides = [1, 1]} : vector<32x1024xf32> to vector<32x128xf32>
    %14 = vector.broadcast %12 : vector<32x1xf32> to vector<32x128xf32>
    %15 = arith.mulf %14, %13 : vector<32x128xf32>
    %16 = vector.extract_strided_slice %1 {offsets = [0, 1], sizes = [32, 1], strides = [1, 1]} : vector<32x8xf32> to vector<32x1xf32>
    %17 = vector.extract_strided_slice %11 {offsets = [0, 128], sizes = [32, 128], strides = [1, 1]} : vector<32x1024xf32> to vector<32x128xf32>
    %18 = vector.broadcast %16 : vector<32x1xf32> to vector<32x128xf32>
    %19 = arith.mulf %18, %17 : vector<32x128xf32>
    %20 = arith.addf %15, %19 : vector<32x128xf32>
    %21 = vector.extract_strided_slice %1 {offsets = [0, 2], sizes = [32, 1], strides = [1, 1]} : vector<32x8xf32> to vector<32x1xf32>
    %22 = vector.extract_strided_slice %11 {offsets = [0, 256], sizes = [32, 128], strides = [1, 1]} : vector<32x1024xf32> to vector<32x128xf32>
    %23 = vector.broadcast %21 : vector<32x1xf32> to vector<32x128xf32>
    %24 = arith.mulf %23, %22 : vector<32x128xf32>
    %25 = arith.addf %20, %24 : vector<32x128xf32>
    %26 = vector.extract_strided_slice %1 {offsets = [0, 3], sizes = [32, 1], strides = [1, 1]} : vector<32x8xf32> to vector<32x1xf32>
    %27 = vector.extract_strided_slice %11 {offsets = [0, 384], sizes = [32, 128], strides = [1, 1]} : vector<32x1024xf32> to vector<32x128xf32>
    %28 = vector.broadcast %26 : vector<32x1xf32> to vector<32x128xf32>
    %29 = arith.mulf %28, %27 : vector<32x128xf32>
    %30 = arith.addf %25, %29 : vector<32x128xf32>
    %31 = vector.extract_strided_slice %1 {offsets = [0, 4], sizes = [32, 1], strides = [1, 1]} : vector<32x8xf32> to vector<32x1xf32>
    %32 = vector.extract_strided_slice %11 {offsets = [0, 512], sizes = [32, 128], strides = [1, 1]} : vector<32x1024xf32> to vector<32x128xf32>
    %33 = vector.broadcast %31 : vector<32x1xf32> to vector<32x128xf32>
    %34 = arith.mulf %33, %32 : vector<32x128xf32>
    %35 = arith.addf %30, %34 : vector<32x128xf32>
    %36 = vector.extract_strided_slice %1 {offsets = [0, 5], sizes = [32, 1], strides = [1, 1]} : vector<32x8xf32> to vector<32x1xf32>
    %37 = vector.extract_strided_slice %11 {offsets = [0, 640], sizes = [32, 128], strides = [1, 1]} : vector<32x1024xf32> to vector<32x128xf32>
    %38 = vector.broadcast %36 : vector<32x1xf32> to vector<32x128xf32>
    %39 = arith.mulf %38, %37 : vector<32x128xf32>
    %40 = arith.addf %35, %39 : vector<32x128xf32>
    %41 = vector.extract_strided_slice %1 {offsets = [0, 6], sizes = [32, 1], strides = [1, 1]} : vector<32x8xf32> to vector<32x1xf32>
    %42 = vector.extract_strided_slice %11 {offsets = [0, 768], sizes = [32, 128], strides = [1, 1]} : vector<32x1024xf32> to vector<32x128xf32>
    %43 = vector.broadcast %41 : vector<32x1xf32> to vector<32x128xf32>
    %44 = arith.mulf %43, %42 : vector<32x128xf32>
    %45 = arith.addf %40, %44 : vector<32x128xf32>
    %46 = vector.extract_strided_slice %1 {offsets = [0, 7], sizes = [32, 1], strides = [1, 1]} : vector<32x8xf32> to vector<32x1xf32>
    %47 = vector.extract_strided_slice %11 {offsets = [0, 896], sizes = [32, 128], strides = [1, 1]} : vector<32x1024xf32> to vector<32x128xf32>
    %48 = vector.broadcast %46 : vector<32x1xf32> to vector<32x128xf32>
    %49 = arith.mulf %48, %47 : vector<32x128xf32>
    %50 = arith.addf %45, %49 : vector<32x128xf32>
    %c0_10 = arith.constant 0 : index
    %c0_11 = arith.constant 0 : index
    %51 = vector.load %arg5[%c0_10, %c0_11] : memref<1x128xf32, #tpu.memory_space<vmem>>, vector<1x128xf32>
    %52 = vector.broadcast %51 : vector<1x128xf32> to vector<32x128xf32>
    %53 = arith.addf %50, %52 : vector<32x128xf32>
    %cst_12 = arith.constant 0.000000e+00 : f32
    %54 = vector.broadcast %cst_12 : f32 to vector<32x128xf32>
    %55 = arith.maximumf %53, %54 : vector<32x128xf32>
    %56 = vector.extract_strided_slice %55 {offsets = [0, 0], sizes = [32, 8], strides = [1, 1]} : vector<32x128xf32> to vector<32x8xf32>
    %57 = vector.extract_strided_slice %55 {offsets = [0, 8], sizes = [32, 8], strides = [1, 1]} : vector<32x128xf32> to vector<32x8xf32>
    %58 = vector.extract_strided_slice %57 {offsets = [0, 0], sizes = [4, 8], strides = [1, 1]} : vector<32x8xf32> to vector<4x8xf32>
    %59 = vector.extract_strided_slice %57 {offsets = [4, 0], sizes = [4, 8], strides = [1, 1]} : vector<32x8xf32> to vector<4x8xf32>
    %60 = arith.addf %58, %59 : vector<4x8xf32>
    %61 = vector.extract_strided_slice %57 {offsets = [8, 0], sizes = [4, 8], strides = [1, 1]} : vector<32x8xf32> to vector<4x8xf32>
    %62 = arith.addf %60, %61 : vector<4x8xf32>
    %63 = vector.extract_strided_slice %57 {offsets = [12, 0], sizes = [4, 8], strides = [1, 1]} : vector<32x8xf32> to vector<4x8xf32>
    %64 = arith.addf %62, %63 : vector<4x8xf32>
    %65 = vector.extract_strided_slice %57 {offsets = [16, 0], sizes = [4, 8], strides = [1, 1]} : vector<32x8xf32> to vector<4x8xf32>
    %66 = arith.addf %64, %65 : vector<4x8xf32>
    %67 = vector.extract_strided_slice %57 {offsets = [20, 0], sizes = [4, 8], strides = [1, 1]} : vector<32x8xf32> to vector<4x8xf32>
    %68 = arith.addf %66, %67 : vector<4x8xf32>
    %69 = vector.extract_strided_slice %57 {offsets = [24, 0], sizes = [4, 8], strides = [1, 1]} : vector<32x8xf32> to vector<4x8xf32>
    %70 = arith.addf %68, %69 : vector<4x8xf32>
    %71 = vector.extract_strided_slice %57 {offsets = [28, 0], sizes = [4, 8], strides = [1, 1]} : vector<32x8xf32> to vector<4x8xf32>
    %72 = arith.addf %70, %71 : vector<4x8xf32>
    %c0_13 = arith.constant 0 : index
    %c0_14 = arith.constant 0 : index
    %73 = vector.load %arg6[%c0_13, %c0_14] : memref<1x8xf32, #tpu.memory_space<vmem>>, vector<1x8xf32>
    %74 = vector.broadcast %73 : vector<1x8xf32> to vector<4x8xf32>
    %75 = arith.mulf %72, %74 : vector<4x8xf32>
    %cst_15 = arith.constant dense<0.000000e+00> : vector<4xf32>
    %76 = vector.multi_reduction <add>, %75, %cst_15 [1] : vector<4x8xf32> to vector<4xf32>
    %77 = vector.shape_cast %76 : vector<4xf32> to vector<4x1xf32>
    %78 = arith.addf %9, %77 : vector<4x1xf32>
    %c0_16 = arith.constant 0 : index
    %c0_17 = arith.constant 0 : index
    %79 = vector.load %arg7[%c0_16, %c0_17] : memref<8x1024xf32, #tpu.memory_space<vmem>>, vector<8x1024xf32>
    %cst_18 = arith.constant dense<0.000000e+00> : vector<32x1024xf32>
    %80 = tpu.matmul %1, %79, %cst_18 {dimension_numbers = #tpu.dot_dimension_numbers<[1], [0], [0], [1], [0, 0, 1, 1], [], []>} : vector<32x8xf32>, vector<8x1024xf32>, vector<32x1024xf32> -> vector<32x1024xf32>
    %81 = vector.extract_strided_slice %56 {offsets = [0, 0], sizes = [32, 1], strides = [1, 1]} : vector<32x8xf32> to vector<32x1xf32>
    %82 = vector.extract_strided_slice %80 {offsets = [0, 0], sizes = [32, 128], strides = [1, 1]} : vector<32x1024xf32> to vector<32x128xf32>
    %83 = vector.broadcast %81 : vector<32x1xf32> to vector<32x128xf32>
    %84 = arith.mulf %83, %82 : vector<32x128xf32>
    %85 = vector.extract_strided_slice %56 {offsets = [0, 1], sizes = [32, 1], strides = [1, 1]} : vector<32x8xf32> to vector<32x1xf32>
    %86 = vector.extract_strided_slice %80 {offsets = [0, 128], sizes = [32, 128], strides = [1, 1]} : vector<32x1024xf32> to vector<32x128xf32>
    %87 = vector.broadcast %85 : vector<32x1xf32> to vector<32x128xf32>
    %88 = arith.mulf %87, %86 : vector<32x128xf32>
    %89 = arith.addf %84, %88 : vector<32x128xf32>
    %90 = vector.extract_strided_slice %56 {offsets = [0, 2], sizes = [32, 1], strides = [1, 1]} : vector<32x8xf32> to vector<32x1xf32>
    %91 = vector.extract_strided_slice %80 {offsets = [0, 256], sizes = [32, 128], strides = [1, 1]} : vector<32x1024xf32> to vector<32x128xf32>
    %92 = vector.broadcast %90 : vector<32x1xf32> to vector<32x128xf32>
    %93 = arith.mulf %92, %91 : vector<32x128xf32>
    %94 = arith.addf %89, %93 : vector<32x128xf32>
    %95 = vector.extract_strided_slice %56 {offsets = [0, 3], sizes = [32, 1], strides = [1, 1]} : vector<32x8xf32> to vector<32x1xf32>
    %96 = vector.extract_strided_slice %80 {offsets = [0, 384], sizes = [32, 128], strides = [1, 1]} : vector<32x1024xf32> to vector<32x128xf32>
    %97 = vector.broadcast %95 : vector<32x1xf32> to vector<32x128xf32>
    %98 = arith.mulf %97, %96 : vector<32x128xf32>
    %99 = arith.addf %94, %98 : vector<32x128xf32>
    %100 = vector.extract_strided_slice %56 {offsets = [0, 4], sizes = [32, 1], strides = [1, 1]} : vector<32x8xf32> to vector<32x1xf32>
    %101 = vector.extract_strided_slice %80 {offsets = [0, 512], sizes = [32, 128], strides = [1, 1]} : vector<32x1024xf32> to vector<32x128xf32>
    %102 = vector.broadcast %100 : vector<32x1xf32> to vector<32x128xf32>
    %103 = arith.mulf %102, %101 : vector<32x128xf32>
    %104 = arith.addf %99, %103 : vector<32x128xf32>
    %105 = vector.extract_strided_slice %56 {offsets = [0, 5], sizes = [32, 1], strides = [1, 1]} : vector<32x8xf32> to vector<32x1xf32>
    %106 = vector.extract_strided_slice %80 {offsets = [0, 640], sizes = [32, 128], strides = [1, 1]} : vector<32x1024xf32> to vector<32x128xf32>
    %107 = vector.broadcast %105 : vector<32x1xf32> to vector<32x128xf32>
    %108 = arith.mulf %107, %106 : vector<32x128xf32>
    %109 = arith.addf %104, %108 : vector<32x128xf32>
    %110 = vector.extract_strided_slice %56 {offsets = [0, 6], sizes = [32, 1], strides = [1, 1]} : vector<32x8xf32> to vector<32x1xf32>
    %111 = vector.extract_strided_slice %80 {offsets = [0, 768], sizes = [32, 128], strides = [1, 1]} : vector<32x1024xf32> to vector<32x128xf32>
    %112 = vector.broadcast %110 : vector<32x1xf32> to vector<32x128xf32>
    %113 = arith.mulf %112, %111 : vector<32x128xf32>
    %114 = arith.addf %109, %113 : vector<32x128xf32>
    %115 = vector.extract_strided_slice %56 {offsets = [0, 7], sizes = [32, 1], strides = [1, 1]} : vector<32x8xf32> to vector<32x1xf32>
    %116 = vector.extract_strided_slice %80 {offsets = [0, 896], sizes = [32, 128], strides = [1, 1]} : vector<32x1024xf32> to vector<32x128xf32>
    %117 = vector.broadcast %115 : vector<32x1xf32> to vector<32x128xf32>
    %118 = arith.mulf %117, %116 : vector<32x128xf32>
    %119 = arith.addf %114, %118 : vector<32x128xf32>
    %c0_19 = arith.constant 0 : index
    %c0_20 = arith.constant 0 : index
    %120 = vector.load %arg8[%c0_19, %c0_20] : memref<1x128xf32, #tpu.memory_space<vmem>>, vector<1x128xf32>
    %121 = vector.broadcast %120 : vector<1x128xf32> to vector<32x128xf32>
    %122 = arith.addf %119, %121 : vector<32x128xf32>
    %cst_21 = arith.constant 0.000000e+00 : f32
    %123 = vector.broadcast %cst_21 : f32 to vector<32x128xf32>
    %124 = arith.maximumf %122, %123 : vector<32x128xf32>
    %125 = vector.extract_strided_slice %124 {offsets = [0, 0], sizes = [32, 8], strides = [1, 1]} : vector<32x128xf32> to vector<32x8xf32>
    %126 = vector.extract_strided_slice %124 {offsets = [0, 8], sizes = [32, 8], strides = [1, 1]} : vector<32x128xf32> to vector<32x8xf32>
    %127 = vector.extract_strided_slice %126 {offsets = [0, 0], sizes = [4, 8], strides = [1, 1]} : vector<32x8xf32> to vector<4x8xf32>
    %128 = vector.extract_strided_slice %126 {offsets = [4, 0], sizes = [4, 8], strides = [1, 1]} : vector<32x8xf32> to vector<4x8xf32>
    %129 = arith.addf %127, %128 : vector<4x8xf32>
    %130 = vector.extract_strided_slice %126 {offsets = [8, 0], sizes = [4, 8], strides = [1, 1]} : vector<32x8xf32> to vector<4x8xf32>
    %131 = arith.addf %129, %130 : vector<4x8xf32>
    %132 = vector.extract_strided_slice %126 {offsets = [12, 0], sizes = [4, 8], strides = [1, 1]} : vector<32x8xf32> to vector<4x8xf32>
    %133 = arith.addf %131, %132 : vector<4x8xf32>
    %134 = vector.extract_strided_slice %126 {offsets = [16, 0], sizes = [4, 8], strides = [1, 1]} : vector<32x8xf32> to vector<4x8xf32>
    %135 = arith.addf %133, %134 : vector<4x8xf32>
    %136 = vector.extract_strided_slice %126 {offsets = [20, 0], sizes = [4, 8], strides = [1, 1]} : vector<32x8xf32> to vector<4x8xf32>
    %137 = arith.addf %135, %136 : vector<4x8xf32>
    %138 = vector.extract_strided_slice %126 {offsets = [24, 0], sizes = [4, 8], strides = [1, 1]} : vector<32x8xf32> to vector<4x8xf32>
    %139 = arith.addf %137, %138 : vector<4x8xf32>
    %140 = vector.extract_strided_slice %126 {offsets = [28, 0], sizes = [4, 8], strides = [1, 1]} : vector<32x8xf32> to vector<4x8xf32>
    %141 = arith.addf %139, %140 : vector<4x8xf32>
    %c0_22 = arith.constant 0 : index
    %c0_23 = arith.constant 0 : index
    %142 = vector.load %arg9[%c0_22, %c0_23] : memref<1x8xf32, #tpu.memory_space<vmem>>, vector<1x8xf32>
    %143 = vector.broadcast %142 : vector<1x8xf32> to vector<4x8xf32>
    %144 = arith.mulf %141, %143 : vector<4x8xf32>
    %cst_24 = arith.constant dense<0.000000e+00> : vector<4xf32>
    %145 = vector.multi_reduction <add>, %144, %cst_24 [1] : vector<4x8xf32> to vector<4xf32>
    %146 = vector.shape_cast %145 : vector<4xf32> to vector<4x1xf32>
    %147 = arith.addf %78, %146 : vector<4x1xf32>
    %c0_25 = arith.constant 0 : index
    %c0_26 = arith.constant 0 : index
    %148 = vector.load %arg10[%c0_25, %c0_26] : memref<8x1024xf32, #tpu.memory_space<vmem>>, vector<8x1024xf32>
    %cst_27 = arith.constant dense<0.000000e+00> : vector<32x1024xf32>
    %149 = tpu.matmul %1, %148, %cst_27 {dimension_numbers = #tpu.dot_dimension_numbers<[1], [0], [0], [1], [0, 0, 1, 1], [], []>} : vector<32x8xf32>, vector<8x1024xf32>, vector<32x1024xf32> -> vector<32x1024xf32>
    %150 = vector.extract_strided_slice %125 {offsets = [0, 0], sizes = [32, 1], strides = [1, 1]} : vector<32x8xf32> to vector<32x1xf32>
    %151 = vector.extract_strided_slice %149 {offsets = [0, 0], sizes = [32, 128], strides = [1, 1]} : vector<32x1024xf32> to vector<32x128xf32>
    %152 = vector.broadcast %150 : vector<32x1xf32> to vector<32x128xf32>
    %153 = arith.mulf %152, %151 : vector<32x128xf32>
    %154 = vector.extract_strided_slice %125 {offsets = [0, 1], sizes = [32, 1], strides = [1, 1]} : vector<32x8xf32> to vector<32x1xf32>
    %155 = vector.extract_strided_slice %149 {offsets = [0, 128], sizes = [32, 128], strides = [1, 1]} : vector<32x1024xf32> to vector<32x128xf32>
    %156 = vector.broadcast %154 : vector<32x1xf32> to vector<32x128xf32>
    %157 = arith.mulf %156, %155 : vector<32x128xf32>
    %158 = arith.addf %153, %157 : vector<32x128xf32>
    %159 = vector.extract_strided_slice %125 {offsets = [0, 2], sizes = [32, 1], strides = [1, 1]} : vector<32x8xf32> to vector<32x1xf32>
    %160 = vector.extract_strided_slice %149 {offsets = [0, 256], sizes = [32, 128], strides = [1, 1]} : vector<32x1024xf32> to vector<32x128xf32>
    %161 = vector.broadcast %159 : vector<32x1xf32> to vector<32x128xf32>
    %162 = arith.mulf %161, %160 : vector<32x128xf32>
    %163 = arith.addf %158, %162 : vector<32x128xf32>
    %164 = vector.extract_strided_slice %125 {offsets = [0, 3], sizes = [32, 1], strides = [1, 1]} : vector<32x8xf32> to vector<32x1xf32>
    %165 = vector.extract_strided_slice %149 {offsets = [0, 384], sizes = [32, 128], strides = [1, 1]} : vector<32x1024xf32> to vector<32x128xf32>
    %166 = vector.broadcast %164 : vector<32x1xf32> to vector<32x128xf32>
    %167 = arith.mulf %166, %165 : vector<32x128xf32>
    %168 = arith.addf %163, %167 : vector<32x128xf32>
    %169 = vector.extract_strided_slice %125 {offsets = [0, 4], sizes = [32, 1], strides = [1, 1]} : vector<32x8xf32> to vector<32x1xf32>
    %170 = vector.extract_strided_slice %149 {offsets = [0, 512], sizes = [32, 128], strides = [1, 1]} : vector<32x1024xf32> to vector<32x128xf32>
    %171 = vector.broadcast %169 : vector<32x1xf32> to vector<32x128xf32>
    %172 = arith.mulf %171, %170 : vector<32x128xf32>
    %173 = arith.addf %168, %172 : vector<32x128xf32>
    %174 = vector.extract_strided_slice %125 {offsets = [0, 5], sizes = [32, 1], strides = [1, 1]} : vector<32x8xf32> to vector<32x1xf32>
    %175 = vector.extract_strided_slice %149 {offsets = [0, 640], sizes = [32, 128], strides = [1, 1]} : vector<32x1024xf32> to vector<32x128xf32>
    %176 = vector.broadcast %174 : vector<32x1xf32> to vector<32x128xf32>
    %177 = arith.mulf %176, %175 : vector<32x128xf32>
    %178 = arith.addf %173, %177 : vector<32x128xf32>
    %179 = vector.extract_strided_slice %125 {offsets = [0, 6], sizes = [32, 1], strides = [1, 1]} : vector<32x8xf32> to vector<32x1xf32>
    %180 = vector.extract_strided_slice %149 {offsets = [0, 768], sizes = [32, 128], strides = [1, 1]} : vector<32x1024xf32> to vector<32x128xf32>
    %181 = vector.broadcast %179 : vector<32x1xf32> to vector<32x128xf32>
    %182 = arith.mulf %181, %180 : vector<32x128xf32>
    %183 = arith.addf %178, %182 : vector<32x128xf32>
    %184 = vector.extract_strided_slice %125 {offsets = [0, 7], sizes = [32, 1], strides = [1, 1]} : vector<32x8xf32> to vector<32x1xf32>
    %185 = vector.extract_strided_slice %149 {offsets = [0, 896], sizes = [32, 128], strides = [1, 1]} : vector<32x1024xf32> to vector<32x128xf32>
    %186 = vector.broadcast %184 : vector<32x1xf32> to vector<32x128xf32>
    %187 = arith.mulf %186, %185 : vector<32x128xf32>
    %188 = arith.addf %183, %187 : vector<32x128xf32>
    %c0_28 = arith.constant 0 : index
    %c0_29 = arith.constant 0 : index
    %189 = vector.load %arg11[%c0_28, %c0_29] : memref<1x128xf32, #tpu.memory_space<vmem>>, vector<1x128xf32>
    %190 = vector.broadcast %189 : vector<1x128xf32> to vector<32x128xf32>
    %191 = arith.addf %188, %190 : vector<32x128xf32>
    %cst_30 = arith.constant 0.000000e+00 : f32
    %192 = vector.broadcast %cst_30 : f32 to vector<32x128xf32>
    %193 = arith.maximumf %191, %192 : vector<32x128xf32>
    %194 = vector.extract_strided_slice %193 {offsets = [0, 0], sizes = [32, 8], strides = [1, 1]} : vector<32x128xf32> to vector<32x8xf32>
    %195 = vector.extract_strided_slice %194 {offsets = [0, 0], sizes = [4, 8], strides = [1, 1]} : vector<32x8xf32> to vector<4x8xf32>
    %196 = vector.extract_strided_slice %194 {offsets = [4, 0], sizes = [4, 8], strides = [1, 1]} : vector<32x8xf32> to vector<4x8xf32>
    %197 = arith.addf %195, %196 : vector<4x8xf32>
    %198 = vector.extract_strided_slice %194 {offsets = [8, 0], sizes = [4, 8], strides = [1, 1]} : vector<32x8xf32> to vector<4x8xf32>
    %199 = arith.addf %197, %198 : vector<4x8xf32>
    %200 = vector.extract_strided_slice %194 {offsets = [12, 0], sizes = [4, 8], strides = [1, 1]} : vector<32x8xf32> to vector<4x8xf32>
    %201 = arith.addf %199, %200 : vector<4x8xf32>
    %202 = vector.extract_strided_slice %194 {offsets = [16, 0], sizes = [4, 8], strides = [1, 1]} : vector<32x8xf32> to vector<4x8xf32>
    %203 = arith.addf %201, %202 : vector<4x8xf32>
    %204 = vector.extract_strided_slice %194 {offsets = [20, 0], sizes = [4, 8], strides = [1, 1]} : vector<32x8xf32> to vector<4x8xf32>
    %205 = arith.addf %203, %204 : vector<4x8xf32>
    %206 = vector.extract_strided_slice %194 {offsets = [24, 0], sizes = [4, 8], strides = [1, 1]} : vector<32x8xf32> to vector<4x8xf32>
    %207 = arith.addf %205, %206 : vector<4x8xf32>
    %208 = vector.extract_strided_slice %194 {offsets = [28, 0], sizes = [4, 8], strides = [1, 1]} : vector<32x8xf32> to vector<4x8xf32>
    %209 = arith.addf %207, %208 : vector<4x8xf32>
    %c0_31 = arith.constant 0 : index
    %c0_32 = arith.constant 0 : index
    %210 = vector.load %arg12[%c0_31, %c0_32] : memref<1x8xf32, #tpu.memory_space<vmem>>, vector<1x8xf32>
    %211 = vector.broadcast %210 : vector<1x8xf32> to vector<4x8xf32>
    %212 = arith.mulf %209, %211 : vector<4x8xf32>
    %cst_33 = arith.constant dense<0.000000e+00> : vector<4xf32>
    %213 = vector.multi_reduction <add>, %212, %cst_33 [1] : vector<4x8xf32> to vector<4xf32>
    %214 = vector.shape_cast %213 : vector<4xf32> to vector<4x1xf32>
    %215 = arith.addf %147, %214 : vector<4x1xf32>
    %c0_34 = arith.constant 0 : index
    %c0_35 = arith.constant 0 : index
    %216 = vector.load %arg13[%c0_34, %c0_35] : memref<64x128xf32, #tpu.memory_space<vmem>>, vector<64x128xf32>
    %cst_36 = arith.constant dense<0.000000e+00> : vector<4x128xf32>
    %217 = tpu.matmul %0, %216, %cst_36 {dimension_numbers = #tpu.dot_dimension_numbers<[1], [0], [0], [1], [0, 0, 1, 1], [], []>} : vector<4x64xf32>, vector<64x128xf32>, vector<4x128xf32> -> vector<4x128xf32>
    %c0_37 = arith.constant 0 : index
    %c0_38 = arith.constant 0 : index
    %218 = vector.load %arg14[%c0_37, %c0_38] : memref<1x128xf32, #tpu.memory_space<vmem>>, vector<1x128xf32>
    %219 = vector.broadcast %218 : vector<1x128xf32> to vector<4x128xf32>
    %220 = arith.addf %217, %219 : vector<4x128xf32>
    %cst_39 = arith.constant dense<0.000000e+00> : vector<128xf32>
    %221 = vector.multi_reduction <add>, %220, %cst_39 [0] : vector<4x128xf32> to vector<128xf32>
    %222 = vector.shape_cast %221 : vector<128xf32> to vector<1x128xf32>
    %cst_40 = arith.constant 4.000000e+00 : f32
    %223 = vector.broadcast %cst_40 : f32 to vector<1x128xf32>
    %224 = arith.divf %222, %223 : vector<1x128xf32>
    %225 = vector.broadcast %224 : vector<1x128xf32> to vector<4x128xf32>
    %226 = arith.subf %220, %225 : vector<4x128xf32>
    %227 = arith.mulf %226, %226 : vector<4x128xf32>
    %cst_41 = arith.constant dense<0.000000e+00> : vector<128xf32>
    %228 = vector.multi_reduction <add>, %227, %cst_41 [0] : vector<4x128xf32> to vector<128xf32>
    %229 = vector.shape_cast %228 : vector<128xf32> to vector<1x128xf32>
    %cst_42 = arith.constant 4.000000e+00 : f32
    %230 = vector.broadcast %cst_42 : f32 to vector<1x128xf32>
    %231 = arith.divf %229, %230 : vector<1x128xf32>
    %232 = vector.broadcast %224 : vector<1x128xf32> to vector<4x128xf32>
    %233 = arith.subf %220, %232 : vector<4x128xf32>
    %cst_43 = arith.constant 9.99999974E-6 : f32
    %234 = vector.broadcast %cst_43 : f32 to vector<1x128xf32>
    %235 = arith.addf %231, %234 : vector<1x128xf32>
    %236 = math.rsqrt %235 : vector<1x128xf32>
    %237 = vector.broadcast %236 : vector<1x128xf32> to vector<4x128xf32>
    %238 = arith.mulf %233, %237 : vector<4x128xf32>
    %c0_44 = arith.constant 0 : index
    %c0_45 = arith.constant 0 : index
    %239 = vector.load %arg15[%c0_44, %c0_45] : memref<1x128xf32, #tpu.memory_space<vmem>>, vector<1x128xf32>
    %240 = vector.broadcast %239 : vector<1x128xf32> to vector<4x128xf32>
    %241 = arith.mulf %238, %240 : vector<4x128xf32>
    %c0_46 = arith.constant 0 : index
    %c0_47 = arith.constant 0 : index
    %242 = vector.load %arg16[%c0_46, %c0_47] : memref<1x128xf32, #tpu.memory_space<vmem>>, vector<1x128xf32>
    %243 = vector.broadcast %242 : vector<1x128xf32> to vector<4x128xf32>
    %244 = arith.addf %241, %243 : vector<4x128xf32>
    %cst_48 = arith.constant 0.000000e+00 : f32
    %245 = vector.broadcast %cst_48 : f32 to vector<4x128xf32>
    %246 = arith.maximumf %244, %245 : vector<4x128xf32>
    %c0_49 = arith.constant 0 : index
    %c0_50 = arith.constant 0 : index
    %247 = vector.load %arg17[%c0_49, %c0_50] : memref<128x128xf32, #tpu.memory_space<vmem>>, vector<128x128xf32>
    %cst_51 = arith.constant dense<0.000000e+00> : vector<4x128xf32>
    %248 = tpu.matmul %246, %247, %cst_51 {dimension_numbers = #tpu.dot_dimension_numbers<[1], [0], [0], [1], [0, 0, 1, 1], [], []>} : vector<4x128xf32>, vector<128x128xf32>, vector<4x128xf32> -> vector<4x128xf32>
    %c0_52 = arith.constant 0 : index
    %c0_53 = arith.constant 0 : index
    %249 = vector.load %arg18[%c0_52, %c0_53] : memref<1x128xf32, #tpu.memory_space<vmem>>, vector<1x128xf32>
    %250 = vector.broadcast %249 : vector<1x128xf32> to vector<4x128xf32>
    %251 = arith.addf %248, %250 : vector<4x128xf32>
    %cst_54 = arith.constant dense<0.000000e+00> : vector<128xf32>
    %252 = vector.multi_reduction <add>, %251, %cst_54 [0] : vector<4x128xf32> to vector<128xf32>
    %253 = vector.shape_cast %252 : vector<128xf32> to vector<1x128xf32>
    %cst_55 = arith.constant 4.000000e+00 : f32
    %254 = vector.broadcast %cst_55 : f32 to vector<1x128xf32>
    %255 = arith.divf %253, %254 : vector<1x128xf32>
    %256 = vector.broadcast %255 : vector<1x128xf32> to vector<4x128xf32>
    %257 = arith.subf %251, %256 : vector<4x128xf32>
    %258 = arith.mulf %257, %257 : vector<4x128xf32>
    %cst_56 = arith.constant dense<0.000000e+00> : vector<128xf32>
    %259 = vector.multi_reduction <add>, %258, %cst_56 [0] : vector<4x128xf32> to vector<128xf32>
    %260 = vector.shape_cast %259 : vector<128xf32> to vector<1x128xf32>
    %cst_57 = arith.constant 4.000000e+00 : f32
    %261 = vector.broadcast %cst_57 : f32 to vector<1x128xf32>
    %262 = arith.divf %260, %261 : vector<1x128xf32>
    %263 = vector.broadcast %255 : vector<1x128xf32> to vector<4x128xf32>
    %264 = arith.subf %251, %263 : vector<4x128xf32>
    %cst_58 = arith.constant 9.99999974E-6 : f32
    %265 = vector.broadcast %cst_58 : f32 to vector<1x128xf32>
    %266 = arith.addf %262, %265 : vector<1x128xf32>
    %267 = math.rsqrt %266 : vector<1x128xf32>
    %268 = vector.broadcast %267 : vector<1x128xf32> to vector<4x128xf32>
    %269 = arith.mulf %264, %268 : vector<4x128xf32>
    %c0_59 = arith.constant 0 : index
    %c0_60 = arith.constant 0 : index
    %270 = vector.load %arg19[%c0_59, %c0_60] : memref<1x128xf32, #tpu.memory_space<vmem>>, vector<1x128xf32>
    %271 = vector.broadcast %270 : vector<1x128xf32> to vector<4x128xf32>
    %272 = arith.mulf %269, %271 : vector<4x128xf32>
    %c0_61 = arith.constant 0 : index
    %c0_62 = arith.constant 0 : index
    %273 = vector.load %arg20[%c0_61, %c0_62] : memref<1x128xf32, #tpu.memory_space<vmem>>, vector<1x128xf32>
    %274 = vector.broadcast %273 : vector<1x128xf32> to vector<4x128xf32>
    %275 = arith.addf %272, %274 : vector<4x128xf32>
    %cst_63 = arith.constant 0.000000e+00 : f32
    %276 = vector.broadcast %cst_63 : f32 to vector<4x128xf32>
    %277 = arith.maximumf %275, %276 : vector<4x128xf32>
    %c0_64 = arith.constant 0 : index
    %c0_65 = arith.constant 0 : index
    %278 = vector.load %arg21[%c0_64, %c0_65] : memref<1x128xf32, #tpu.memory_space<vmem>>, vector<1x128xf32>
    %279 = vector.broadcast %278 : vector<1x128xf32> to vector<4x128xf32>
    %280 = arith.mulf %277, %279 : vector<4x128xf32>
    %cst_66 = arith.constant dense<0.000000e+00> : vector<4xf32>
    %281 = vector.multi_reduction <add>, %280, %cst_66 [1] : vector<4x128xf32> to vector<4xf32>
    %282 = vector.shape_cast %281 : vector<4xf32> to vector<4x1xf32>
    %283 = arith.addf %215, %282 : vector<4x1xf32>
    %284 = arith.negf %283 : vector<4x1xf32>
    %285 = math.exp %284 : vector<4x1xf32>
    %cst_67 = arith.constant 1.000000e+00 : f32
    %286 = vector.broadcast %cst_67 : f32 to vector<4x1xf32>
    %287 = arith.addf %286, %285 : vector<4x1xf32>
    %288 = arith.divf %286, %287 : vector<4x1xf32>
    %c0_68 = arith.constant 0 : index
    %c0_69 = arith.constant 0 : index
    %289 = vector.load %arg22[%c0_68, %c0_69] : memref<4x1xf32, #tpu.memory_space<vmem>>, vector<4x1xf32>
    tpu.vector_store %arg22[%c0_68, %c0_69], %288 {strides = array<i32>} : memref<4x1xf32, #tpu.memory_space<vmem>>, vector<4x1xf32>,
    return
  }
}

</mosaic_0001>

<bundles_post_ra>
// kernel: tpu_custom_call.1
= control target key start
LH: loop header
LB: loop body
LE: loop exit
PB: predicated region body
PF: predicated region fallthrough
CT: control target
= control target key end

     0   :  { %s3698_s0 = inlined_call_operand.hbm [shape: f32[4,64], index: 0, kind: input, shape index: {}]   ;;  %s3699_s1 = inlined_call_operand.vmem [shape: f32[32,8], index: 1, kind: input, shape index: {}]   ;;  %s3700_s2 = inlined_call_operand.vmem [shape: f32[1,64], index: 2, kind: input, shape index: {}]   ;;  %s3701_s3 = inlined_call_operand.<no memory space> [shape: f32[1,1], index: 3, kind: input, shape index: {}]   ;;  %s3702_s4 = inlined_call_operand.hbm [shape: f32[8,1024], index: 4, kind: input, shape index: {}]   ;;  %s3703_s5 = inlined_call_operand.vmem [shape: f32[1,128], index: 5, kind: input, shape index: {}]   ;;  %s3704_s6 = inlined_call_operand.hbm [shape: f32[1,8], index: 6, kind: input, shape index: {}]   ;;  %s3705_s7 = inlined_call_operand.vmem [shape: f32[8,1024], index: 7, kind: input, shape index: {}]   ;;  %s3706_s8 = inlined_call_operand.vmem [shape: f32[1,128], index: 8, kind: input, shape index: {}]   ;;  %s3707_s9 = inlined_call_operand.vmem [shape: f32[1,8], index: 9, kind: input, shape index: {}]   ;;  %s3708_s10 = inlined_call_operand.hbm [shape: f32[8,1024], index: 10, kind: input, shape index: {}]   ;;  %s3709_s11 = inlined_call_operand.vmem [shape: f32[1,128], index: 11, kind: input, shape index: {}]   ;;  %s3710_s12 = inlined_call_operand.vmem [shape: f32[1,8], index: 12, kind: input, shape index: {}]   ;;  %s3711_s13 = inlined_call_operand.hbm [shape: f32[64,128], index: 13, kind: input, shape index: {}]   ;;  %s3712_s14 = inlined_call_operand.vmem [shape: f32[1,128], index: 14, kind: input, shape index: {}]   ;;  %s3713_s15 = inlined_call_operand.vmem [shape: f32[1,128], index: 15, kind: input, shape index: {}]   ;;  %s3714_s16 = inlined_call_operand.vmem [shape: f32[1,128], index: 16, kind: input, shape index: {}]   ;;  %s3715_s17 = inlined_call_operand.hbm [shape: f32[128,128], index: 17, kind: input, shape index: {}]   ;;  %s3716_s18 = inlined_call_operand.vmem [shape: f32[1,128], index: 18, kind: input, shape index: {}]   ;;  %s3717_s19 = inlined_call_operand.vmem [shape: f32[1,128], index: 19, kind: input, shape index: {}]   ;;  %s3718_s20 = inlined_call_operand.vmem [shape: f32[1,128], index: 20, kind: input, shape index: {}]   ;;  %s3719_s21 = inlined_call_operand.vmem [shape: f32[1,128], index: 21, kind: input, shape index: {}]   ;;  %s3720_s22 = inlined_call_operand.vmem [shape: f32[4,1], index: 22, kind: output, shape index: {}]  }
   0x1   :  { %3741 = sst [smem:[#allocation27_spill]] %s3698_s0 }
   0x2   :  { %3742 = sst [smem:[#allocation28_spill]] %s3699_s1 }
   0x3   :  { %3743 = sst [smem:[#allocation29_spill]] %s3700_s2 }
   0x4   :  { %3744 = sst [smem:[#allocation30_spill]] %s3701_s3 }
   0x5   :  { %3745 = sst [smem:[#allocation31_spill]] %s3702_s4  ;;  %s3748_s29 = sld [smem:[#allocation30_spill]] }
   0x6   :  { %3746 = sst [smem:[#allocation32_spill]] %s3703_s5 }
   0x7   :  { %3747 = sst [smem:[#allocation33_spill]] %s3704_s6 }
   0xb   :  { %v27_v0 = vstv %s3748_s29 }
   0xc   :  { %28 = vst [vmem:[#allocation2] sm:$0x1] %v27_v0 }
   0xd   :  { %29 = vsyncpa [#allocation4], 0 }
   0xe   :  { %30 = vsyncpa [#allocation6], 0 }
   0xf   :  { %31 = vsyncpa [#allocation9], 0 }
  0x10   :  { %32 = vsyncpa [#allocation12], 0  ;;  %s2708_s30 = smov [#allocation5]   ;;  %s2709_s0 = smov [#allocation8]  }
  0x11   :  { %s55_s4 = sshll.u32 %s2708_s30, 4  ;;  %s83_s23 = sshll.u32 %s2709_s0, 4  ;;  %s56_s4 = int_to_ptr.vmem [resolvable:$true] %s55_s4  ;;  %s84_s23 = int_to_ptr.vmem [resolvable:$true] %s83_s23 }
  0x12   :  { %s3749_s24 = sld [smem:[#allocation31_spill]] }
  0x18   :  { %s2568_s6 = scalar_lea.hbm %s3749_s24, 1024 }
  0x19   :  { %p2569_p0 = scmp.ne.s32.totalorder %s3749_s24, %s2568_s6  ;;  %p2572_p1 = scmp.lt.u32.totalorder %s2568_s6, %s3749_s24 }
  0x1b   :  { %p2574_p2 = pnand %p2572_p1, %p2569_p0 }
  0x1d   :  { %2577 = shalt.err (!%p2574_p2)
}
  0x1e   :  { %s2578_s3 = scalar_lea.vmem %s56_s4, 1024  ;;  %p2583_p4 = scmp.lt.s32.totalorder %s56_s4, %s56_s4 }
  0x1f   :  { %p2579_p3 = scmp.ne.s32.totalorder %s56_s4, %s2578_s3  ;;  %p2584_p5 = scmp.lt.s32.totalorder %s2578_s3, %s2578_s3 }
  0x21   :  { %p2585_p6 = por %p2584_p5, %p2583_p4 }
  0x23   :  { %p2586_p7 = pnand %p2585_p6, %p2579_p3 }
  0x25   :  { %2589 = shalt.err (!%p2586_p7)
}
  0x26   :  { %58 = dma.hbm_to_vmem [thread:$0]  %s3749_s24, 1024, %s56_s4, [#allocation6]  }
  0x27   :  { %s2590_s1 = scalar_lea.hbm %s3708_s10, 1024 }
  0x28   :  { %p2591_p8 = scmp.ne.s32.totalorder %s3708_s10, %s2590_s1  ;;  %p2594_p9 = scmp.lt.u32.totalorder %s2590_s1, %s3708_s10 }
  0x2a   :  { %p2596_p10 = pnand %p2594_p9, %p2591_p8 }
  0x2c   :  { %2599 = shalt.err (!%p2596_p10)
}
  0x2d   :  { %s2600_s2 = scalar_lea.vmem %s84_s23, 1024  ;;  %p2605_p12 = scmp.lt.s32.totalorder %s84_s23, %s84_s23 }
  0x2e   :  { %p2601_p11 = scmp.ne.s32.totalorder %s84_s23, %s2600_s2  ;;  %p2606_p13 = scmp.lt.s32.totalorder %s2600_s2, %s2600_s2 }
  0x30   :  { %p2607_p0 = por %p2606_p13, %p2605_p12 }
  0x32   :  { %p2608_p1 = pnand %p2607_p0, %p2601_p11 }
  0x34   :  { %2611 = shalt.err (!%p2608_p1)
}
  0x35   :  { %86 = dma.hbm_to_vmem [thread:$0]  %s3708_s10, 1024, %s84_s23, [#allocation9]  }
  0x36   :  { %s2710_s27 = smov [#allocation3]   ;;  %s2711_s28 = smov [#allocation7]  }
  0x37   :  { %s39_s3 = sshll.u32 %s2710_s27, 4  ;;  %s67_s29 = sshll.u32 %s2711_s28, 4  ;;  %s40_s3 = int_to_ptr.vmem [resolvable:$true] %s39_s3  ;;  %s68_s29 = int_to_ptr.vmem [resolvable:$true] %s67_s29 }
  0x38   :  { %s3750_s1 = sld [smem:[#allocation27_spill]] }
  0x3e   :  { %s2612_s5 = scalar_lea.hbm %s3750_s1, 64 }
  0x3f   :  { %p2613_p2 = scmp.ne.s32.totalorder %s3750_s1, %s2612_s5  ;;  %p2616_p3 = scmp.lt.u32.totalorder %s2612_s5, %s3750_s1 }
  0x41   :  { %p2618_p4 = pnand %p2616_p3, %p2613_p2 }
  0x43   :  { %2621 = shalt.err (!%p2618_p4)
}
  0x44   :  { %s2622_s10 = scalar_lea.vmem %s40_s3, 64  ;;  %p2627_p6 = scmp.lt.s32.totalorder %s40_s3, %s40_s3 }
  0x45   :  { %p2623_p5 = scmp.ne.s32.totalorder %s40_s3, %s2622_s10  ;;  %p2628_p7 = scmp.lt.s32.totalorder %s2622_s10, %s2622_s10 }
  0x47   :  { %p2629_p8 = por %p2628_p7, %p2627_p6 }
  0x49   :  { %p2630_p9 = pnand %p2629_p8, %p2623_p5 }
  0x4b   :  { %2633 = shalt.err (!%p2630_p9)
}
  0x4c   :  { %42 = dma.hbm_to_vmem [thread:$0]  %s3750_s1, 64, %s40_s3, [#allocation4]  }
  0x4d   :  { %s3751_s28 = sld [smem:[#allocation33_spill]] }
  0x53   :  { %s2634_s30 = scalar_lea.hbm %s3751_s28, 16 }
  0x54   :  { %p2635_p10 = scmp.ne.s32.totalorder %s3751_s28, %s2634_s30  ;;  %p2638_p11 = scmp.lt.u32.totalorder %s2634_s30, %s3751_s28 }
  0x56   :  { %p2640_p12 = pnand %p2638_p11, %p2635_p10 }
  0x58   :  { %2643 = shalt.err (!%p2640_p12)
}
  0x59   :  { %s2644_s26 = scalar_lea.vmem %s68_s29, 16  ;;  %s2648_s2 = scalar_lea.vmem %s68_s29, 32 }
  0x5a   :  { %p2645_p13 = scmp.ne.s32.totalorder %s68_s29, %s2644_s26  ;;  %p2649_p0 = scmp.lt.s32.totalorder %s68_s29, %s68_s29 }
  0x5b   :  { %p2650_p1 = scmp.lt.s32.totalorder %s2648_s2, %s2644_s26 }
  0x5d   :  { %p2651_p2 = por %p2650_p1, %p2649_p0 }
  0x5f   :  { %p2652_p3 = pnand %p2651_p2, %p2645_p13 }
  0x61   :  { %2655 = shalt.err (!%p2652_p3)
}
  0x62   :  { %70 = dma.hbm_to_vmem [thread:$0]  %s3751_s28, 16, %s68_s29, [#allocation6]  }
  0x63   :  { %s2712_s10 = smov [#allocation10]   ;;  %s2656_s27 = scalar_lea.hbm %s3711_s13, 1024 }
  0x64   :  { %s96_s23 = sshll.u32 %s2712_s10, 4  ;;  %p2657_p4 = scmp.ne.s32.totalorder %s3711_s13, %s2656_s27  ;;  %s97_s23 = int_to_ptr.vmem [resolvable:$true] %s96_s23 }
  0x65   :  { %p2660_p5 = scmp.lt.u32.totalorder %s2656_s27, %s3711_s13 }
  0x67   :  { %p2662_p6 = pnand %p2660_p5, %p2657_p4 }
  0x69   :  { %2665 = shalt.err (!%p2662_p6)
}
  0x6a   :  { %s2666_s6 = scalar_lea.vmem %s97_s23, 1024  ;;  %p2671_p8 = scmp.lt.s32.totalorder %s97_s23, %s97_s23 }
  0x6b   :  { %p2667_p7 = scmp.ne.s32.totalorder %s97_s23, %s2666_s6  ;;  %p2672_p9 = scmp.lt.s32.totalorder %s2666_s6, %s2666_s6 }
  0x6d   :  { %p2673_p10 = por %p2672_p9, %p2671_p8 }
  0x6f   :  { %p2674_p11 = pnand %p2673_p10, %p2667_p7 }
  0x71   :  { %2677 = shalt.err (!%p2674_p11)
}
  0x72   :  { %s2713_s29 = smov 128   ;;  %s2714_s28 = smov 8  }
  0x73   :  { %102 = dma.hbm_to_vmem [thread:$0]  %s3711_s13, 1024, %s97_s23, [#allocation9], %s2713_s29, %s2713_s29, %s2714_s28  }
  0x74   :  { %s2715_s3 = smov [#allocation11]   ;;  %s2678_s24 = scalar_lea.hbm %s3715_s17, 2048 }
  0x75   :  { %s114_s1 = sshll.u32 %s2715_s3, 4  ;;  %p2679_p12 = scmp.ne.s32.totalorder %s3715_s17, %s2678_s24  ;;  %s115_s1 = int_to_ptr.vmem [resolvable:$true] %s114_s1 }
  0x76   :  { %p2682_p13 = scmp.lt.u32.totalorder %s2678_s24, %s3715_s17 }
  0x78   :  { %p2684_p0 = pnand %p2682_p13, %p2679_p12 }
  0x7a   :  { %2687 = shalt.err (!%p2684_p0)
}
  0x7b   :  { %s2688_s5 = scalar_lea.vmem %s115_s1, 2048  ;;  %p2693_p2 = scmp.lt.s32.totalorder %s115_s1, %s115_s1 }
  0x7c   :  { %p2689_p1 = scmp.ne.s32.totalorder %s115_s1, %s2688_s5  ;;  %p2694_p3 = scmp.lt.s32.totalorder %s2688_s5, %s2688_s5 }
  0x7e   :  { %p2695_p4 = por %p2694_p3, %p2693_p2 }
  0x80   :  { %p2696_p5 = pnand %p2695_p4, %p2689_p1 }
  0x82   :  { %2699 = shalt.err (!%p2696_p5)
}
  0x83   :  { %120 = dma.hbm_to_vmem [thread:$0]  %s3715_s17, 2048, %s115_s1, [#allocation12], %s2713_s29, %s2713_s29, %s2714_s28  }
  0x84   :  { %2700 = dma.done.wait [#allocation4], 64  }
  0x85   :  { %2701 = vsyncadd [#allocation4], 4294967232 }
  0x86   :  { %2702 = dma.done.wait [#allocation6], 1040  }
  0x87   :  { %2703 = vsyncadd [#allocation6], 4294966256 }
  0x88   :  { %2704 = dma.done.wait [#allocation9], 2048  }
  0x89   :  { %2705 = vsyncadd [#allocation9], 4294965248 }
  0x8a   :  { %2706 = dma.done.wait [#allocation12], 2048  }
  0x8b   :  { %2707 = vsyncadd [#allocation12], 4294965248  ;;  %v2716_v1 = vmov 0.0   ;;  %v3735_v2 = vmov 0   ;;  %v173_v3 = vld [vmem:[#allocation5 + $0x8] sm:$0xff]  ;;  %v175_v4 = vld [vmem:[#allocation5 + $0x18] sm:$0xff] }
  0x8c   :  { %257 = vmatprep.mubr.f32.mxu0 %v2716_v1  ;;  %358 = vmatprep.mubr.f32.mxu1 %v2716_v1  ;;  %v172_v5 = vld [vmem:[#allocation5] sm:$0xff]  ;;  %vm180_vm0 = vcmask 64512   ;;  %v174_v6 = vld [vmem:[#allocation5 + $0x10] sm:$0xff]  ;;  %s3752_s29 = sld [smem:[#allocation28_spill]]  ;;  %v179_v9 = vld [vmem:[#allocation5 + $0x38] sm:$0xff]  ;;  %s3753_s30 = sld [smem:[#allocation29_spill]] }
  0x8d   :  { %2484 = vset.pattern.permute.xlu1 %v3735_v2  ;;  %2483 = vset.pattern.permute.xlu0 %v3735_v2  ;;  %v178_v11 = vld [vmem:[#allocation5 + $0x30] sm:$0xff]  ;;  %v2950_v13 = vld [vmem:[#allocation3] sm:$0xf]  ;;  %vm161_vm1 = vcmask 519168   ;;  %v177_v15 = vld [vmem:[#allocation5 + $0x28] sm:$0xff]  ;;  %v3737_v19 = vmov 1  }
  0x8e   :  { %193 = vmatprep.subr.mxu0 %v173_v3  ;;  %2461 = vmatprep.subr.mxu1 %v175_v4  ;;  %v176_v18 = vld [vmem:[#allocation5 + $0x20] sm:$0xff]  ;;  %v793_v21 = vld [vmem:[%s3705_s7 + $0x18] sm:$0xff]  ;;  %v792_v22 = vld [vmem:[%s3705_s7 + $0x10] sm:$0xff]  ;;  %v3739_v25 = vmov 2   ;;  %v3733_v27 = vmov 3   ;;  %v3731_v30 = vmov 4  }
  0x8f   :  { %194 = vmatpush1.msra.mxu0 %v172_v5  ;;  %2462 = vmatpush1.msra.mxu1 %v174_v6  ;;  %v791_v20 = vld [vmem:[%s3705_s7 + $0x8] sm:$0xff]  ;;  %v790_v23 = vld [vmem:[%s3705_s7] sm:$0xff]  ;;  %v797_v26 = vld [vmem:[%s3705_s7 + $0x38] sm:$0xff]  ;;  %v3729_v32 = vmov 5   ;;  %v3727_v34 = vmov 6   ;;  %v3725_v36 = vmov 7  }
  0x90   :  { %282 = vmatprep.subr.mxu0 %v175_v4  ;;  %460 = vmatprep.subr.mxu1 %v179_v9  ;;  %v795_v24 = vld [vmem:[%s3705_s7 + $0x28] sm:$0xff]  ;;  %v796_v28 = vld [vmem:[%s3705_s7 + $0x30] sm:$0xff]  ;;  %v794_v29 = vld [vmem:[%s3705_s7 + $0x20] sm:$0xff]  ;;  %v2725_v39 = vmov 0.0|0.0   ;;  %vm2726_vm2 = vmmov 0   ;;  %vm2007_vm3 = vcmask 523264  }
  0x91   :  { %v1395_v31 = vld [vmem:[#allocation8 + $0x8] sm:$0xff]  ;;  %v1394_v33 = vld [vmem:[#allocation8] sm:$0xff]  ;;  %v2299_v37 = vld [vmem:[#allocation7] ss:$0 sm:$0xff]  ;;  %s3754_s0 = sld [smem:[#allocation32_spill]]  ;;  %vm2081_vm4 = vcmask 1043456  }
  0x92   :  { %v2927_v7 = vld [vmem:[%s3752_s29] sm:$0xff]  ;;  %v2932_v8 = vld [vmem:[%s3752_s29 + $0x10] sm:$0xff]  ;;  %v2941_v10 = vld [vmem:[%s3752_s29 + $0x8] sm:$0xff]  ;;  %vm785_vm5 = vcmask 60416   ;;  %vm2270_vm6 = vcmask 3072  }
  0x93   :  { %2282 = vmatmul.mubr.msk.f32.vlgmr.msra.gmra.mrb[0].mxu0 %vm180_vm0, %v2927_v7  ;;  %2288 = vmatmul.mubr.msk.f32.vlgmr.msra.gmra.mrb[0].mxu1 %vm180_vm0, %v2932_v8  ;;  %v2948_v12 = vld [vmem:[%s3752_s29 + $0x18] sm:$0xff]  ;;  %v2280_v14 = vld [vmem:[%s3753_s30] ss:$0 sm:$0xff]  ;;  %v1399_v35 = vld [vmem:[#allocation8 + $0x28] sm:$0xff] }
  0x94   :  { %283 = vmatpush1.msra.mxu0 %v174_v6  ;;  %263 = vmatprep.mubr.f32.mxu0 %v2716_v1  ;;  %v160_v16 = vmul.f32 %v2280_v14, %v2950_v13  ;;  %v1398_v38 = vld [vmem:[#allocation8 + $0x20] sm:$0xff]  ;;  %v1993_v41 = vld [vmem:[#allocation10 + $0x8] sm:$0xff]  ;;  %v1994_v43 = vld [vmem:[#allocation10 + $0x10] sm:$0xff] }
  0x95   :  { %364 = vmatprep.mubr.f32.mxu1 %v2716_v1  ;;  %554 = vperm.xlu1 %2484, %v2941_v10   ;;  %v1992_v40 = vld [vmem:[#allocation10] sm:$0xff]  ;;  %v1995_v44 = vld [vmem:[#allocation10 + $0x18] sm:$0xff]  ;;  %v1997_v47 = vld [vmem:[#allocation10 + $0x28] sm:$0xff] }
  0x96   :  { %461 = vmatpush1.msra.mxu1 %v178_v11  ;;  %v162_v17 = vsel %vm161_vm1, %v160_v16, 0.0  ;;  %371 = vmatprep.subr.mxu0 %v177_v15  ;;  %v2426_v42 = vpack.c.bf16 %v1993_v41, %v1992_v40  ;;  %v2429_v45 = vpack.c.bf16 %v1995_v44, %v1994_v43  ;;  %v1996_v46 = vld [vmem:[#allocation10 + $0x20] sm:$0xff]  ;;  %v1998_v49 = vld [vmem:[#allocation10 + $0x30] sm:$0xff]  ;;  %v1999_v50 = vld [vmem:[#allocation10 + $0x38] sm:$0xff] }
  0x97   :  { %2283 = vmatmul.mubr.msk.f32.gmra.mrb[2].mxu0 %vm180_vm0, %v2941_v10  ;;  %2289 = vmatmul.mubr.msk.f32.gmra.mrb[2].mxu1 %vm180_vm0, %v2948_v12  ;;  %v2432_v48 = vpack.c.bf16 %v1997_v47, %v1996_v46  ;;  %v2435_v51 = vpack.c.bf16 %v1999_v50, %v1998_v49  ;;  %v2317_v52 = vld [vmem:[%s3707_s9] ss:$0 sm:$0xff]  ;;  %v1396_v9 = vld [vmem:[#allocation8 + $0x10] sm:$0xff] }
  0x98   :  { %269 = vmatprep.mubr.f32.mxu0 %v2716_v1  ;;  %524 = vmatprep.mubr.f32.mxu1 %v2716_v1  ;;  %v1397_v5 = vld [vmem:[#allocation8 + $0x18] sm:$0xff]  ;;  %v2123_v43 = vld [vmem:[#allocation11 + $0x10] sm:$0xff] }
  0x99   :  { %558 = vperm.xlu1 %2484, %v2932_v8   ;;  %163 = vadd.xlane.f32.xlu0 %v162_v17  ;;  %v2124_v44 = vld [vmem:[#allocation11 + $0x18] sm:$0xff] }
  0x9a   :  { %887 = vmatprep.subr.mxu1 %v793_v21  ;;  %v2441_v47 = vpack.c.bf16 %v2124_v44, %v2123_v43  ;;  %v2130_v43 = vld [vmem:[#allocation11 + $0x48] sm:$0xff] }
  0x9b   :  { %2284 = vmatmul.mubr.msk.f32.gmra.mrb[4].mxu0 %vm180_vm0, %v2932_v8  ;;  %2294 = vmatmul.mubr.msk.f32.vlgmr.msra.gmra.mrb[4].mxu1 %vm180_vm0, %v2927_v7 }
  0x9c   :  { %275 = vmatprep.mubr.f32.mxu0 %v2716_v1  ;;  %530 = vmatprep.mubr.f32.mxu1 %v2716_v1 }
  0x9d   :  { %562 = vperm.xlu1 %2484, %v2948_v12   ;;  %888 = vmatpush1.msra.mxu1 %v792_v22 }
  0x9e   :  { %1065 = vmatprep.subr.mxu1 %v797_v26  ;;  %v2122_v26 = vld [vmem:[#allocation11 + $0x8] sm:$0xff] }
  0x9f   :  { %2285 = vmatmul.mubr.msk.f32.gmra.mrb[6].mxu0 %vm180_vm0, %v2948_v12  ;;  %2295 = vmatmul.mubr.msk.f32.gmra.mrb[6].mxu1 %vm180_vm0, %v2941_v10 }
  0xa0   :  { %346 = vmatprep.mubr.f32.mxu0 %v2716_v1  ;;  %536 = vmatprep.mubr.f32.mxu1 %v2716_v1 }
  0xa1   :  { %2485 = vset.pattern.permute.xlu1 %v3737_v19 }
  0xa2   :  { %570 = vperm.xlu1 %2485, %v2927_v7  }
  0xa3   :  { %2286 = vmatmul.mubr.msk.f32.vlgmr.msra.gmra.mrb[8].mxu0 %vm180_vm0, %v2927_v7  ;;  %2296 = vmatmul.mubr.msk.f32.gmra.mrb[8].mxu1 %vm180_vm0, %v2932_v8 }
  0xa4   :  { %372 = vmatpush1.msra.mxu0 %v176_v18  ;;  %352 = vmatprep.mubr.f32.mxu0 %v2716_v1  ;;  %v1401_v18 = vld [vmem:[#allocation8 + $0x38] sm:$0xff] }
  0xa5   :  { %798 = vmatprep.subr.mxu0 %v791_v20  ;;  %542 = vmatprep.mubr.f32.mxu1 %v2716_v1 }
  0xa6   :  { %574 = vperm.xlu1 %2485, %v2941_v10  }
  0xa7   :  { %2287 = vmatmul.mubr.msk.f32.gmra.mrb[10].mxu0 %vm180_vm0, %v2941_v10  ;;  %2297 = vmatmul.mubr.msk.f32.gmra.mrb[10].mxu1 %vm180_vm0, %v2948_v12 }
  0xa8   :  { %435 = vmatprep.mubr.f32.mxu0 %v2716_v1  ;;  %951 = vmatprep.mubr.f32.mxu1 %v2716_v1 }
  0xaa   :  { %578 = vperm.xlu1 %2485, %v2932_v8  }
  0xab   :  { %2290 = vmatmul.mubr.msk.f32.vlgmr.msra.gmra.mrb[12].mxu0 %vm180_vm0, %v2927_v7  ;;  %2304 = vmatmul.mubr.msk.f32.vlgmr.msra.gmra.mrb[12].mxu1 %vm180_vm0, %v2927_v7 }
  0xac   :  { %441 = vmatprep.mubr.f32.mxu0 %v2716_v1  ;;  %799 = vmatpush1.msra.mxu0 %v790_v23  ;;  %v1400_v23 = vld [vmem:[#allocation8 + $0x30] sm:$0xff] }
  0xad   :  { %976 = vmatprep.subr.mxu0 %v795_v24  ;;  %957 = vmatprep.mubr.f32.mxu1 %v2716_v1  ;;  %v2121_v24 = vld [vmem:[#allocation11] sm:$0xff] }
  0xae   :  { %582 = vperm.xlu1 %2485, %v2948_v12   ;;  %1066 = vmatpush1.msra.mxu1 %v796_v28 }
  0xaf   :  { %2291 = vmatmul.mubr.msk.f32.gmra.mrb[14].mxu0 %vm180_vm0, %v2941_v10  ;;  %550 = vperm.xlu0 %2483, %v2927_v7  }
  0xb0   :  { %447 = vmatprep.mubr.f32.mxu0 %v2716_v1  ;;  %2305 = vmatmul.mubr.msk.f32.gmra.mrb[14].mxu1 %vm180_vm0, %v2941_v10 }
  0xb1   :  { %963 = vmatprep.mubr.f32.mxu1 %v2716_v1  ;;  %1491 = vmatprep.subr.mxu1 %v1397_v5 }
  0xb2   :  { %2486 = vset.pattern.permute.xlu1 %v3739_v25 }
  0xb3   :  { %2292 = vmatmul.mubr.msk.f32.gmra.mrb[16].mxu0 %vm180_vm0, %v2932_v8  ;;  %594 = vperm.xlu1 %2486, %v2927_v7  }
  0xb4   :  { %453 = vmatprep.mubr.f32.mxu0 %v2716_v1  ;;  %2488 = vset.pattern.permute.xlu0 %v3733_v27 }
  0xb5   :  { %2306 = vmatmul.mubr.msk.f32.gmra.mrb[16].mxu1 %vm180_vm0, %v2932_v8  ;;  %622 = vperm.xlu0 %2488, %v2941_v10  }
  0xb6   :  { %969 = vmatprep.mubr.f32.mxu1 %v2716_v1 }
  0xb7   :  { %2293 = vmatmul.mubr.msk.f32.gmra.mrb[18].mxu0 %vm180_vm0, %v2948_v12  ;;  %598 = vperm.xlu1 %2486, %v2941_v10  }
  0xb8   :  { %862 = vmatprep.mubr.f32.mxu0 %v2716_v1 }
  0xb9   :  { %2307 = vmatmul.mubr.msk.f32.gmra.mrb[18].mxu1 %vm180_vm0, %v2948_v12  ;;  %2489 = vset.pattern.permute.xlu0 %v3731_v30 }
  0xba   :  { %642 = vperm.xlu0 %2489, %v2927_v7   ;;  %1129 = vmatprep.mubr.f32.mxu1 %v2716_v1 }
  0xbb   :  { %2300 = vmatmul.mubr.msk.f32.vlgmr.msra.gmra.mrb[20].mxu0 %vm180_vm0, %v2927_v7  ;;  %602 = vperm.xlu1 %2486, %v2932_v8  }
  0xbc   :  { %868 = vmatprep.mubr.f32.mxu0 %v2716_v1  ;;  %977 = vmatpush1.msra.mxu0 %v794_v29 }
  0xbd   :  { %1402 = vmatprep.subr.mxu0 %v1395_v31  ;;  %2312 = vmatmul.mubr.msk.f32.vlgmr.msra.gmra.mrb[20].mxu1 %vm180_vm0, %v2927_v7  ;;  %v2438_v31 = vpack.c.bf16 %v2122_v26, %v2121_v24 }
  0xbe   :  { %654 = vperm.xlu0 %2489, %v2948_v12   ;;  %1135 = vmatprep.mubr.f32.mxu1 %v2716_v1 }
  0xbf   :  { %2301 = vmatmul.mubr.msk.f32.gmra.mrb[22].mxu0 %vm180_vm0, %v2941_v10  ;;  %606 = vperm.xlu1 %2486, %v2948_v12  }
  0xc0   :  { %874 = vmatprep.mubr.f32.mxu0 %v2716_v1  ;;  %1492 = vmatpush1.msra.mxu1 %v1396_v9 }
  0xc1   :  { %2313 = vmatmul.mubr.msk.f32.gmra.mrb[22].mxu1 %vm180_vm0, %v2941_v10  ;;  %1669 = vmatprep.subr.mxu1 %v1401_v18 }
  0xc2   :  { %2492 = vset.pattern.permute.xlu0 %v3729_v32  ;;  %1141 = vmatprep.mubr.f32.mxu1 %v2716_v1 }
  0xc3   :  { %2302 = vmatmul.mubr.msk.f32.gmra.mrb[24].mxu0 %vm180_vm0, %v2932_v8  ;;  %2487 = vset.pattern.permute.xlu1 %v3733_v27 }
  0xc4   :  { %880 = vmatprep.mubr.f32.mxu0 %v2716_v1  ;;  %618 = vperm.xlu1 %2487, %v2927_v7  }
  0xc5   :  { %670 = vperm.xlu0 %2492, %v2941_v10   ;;  %2314 = vmatmul.mubr.msk.f32.gmra.mrb[24].mxu1 %vm180_vm0, %v2932_v8 }
  0xc6   :  { %1147 = vmatprep.mubr.f32.mxu1 %v2716_v1 }
  0xc7   :  { %2303 = vmatmul.mubr.msk.f32.gmra.mrb[26].mxu0 %vm180_vm0, %v2948_v12 }
  0xc8   :  { %1040 = vmatprep.mubr.f32.mxu0 %v2716_v1  ;;  %626 = vperm.xlu1 %2487, %v2932_v8  }
  0xc9   :  { %2493 = vset.pattern.permute.xlu0 %v3727_v34  ;;  %2315 = vmatmul.mubr.msk.f32.gmra.mrb[26].mxu1 %vm180_vm0, %v2948_v12 }
  0xca   :  { %690 = vperm.xlu0 %2493, %v2927_v7   ;;  %1555 = vmatprep.mubr.f32.mxu1 %v2716_v1 }
  0xcb   :  { %2308 = vmatmul.mubr.msk.f32.vlgmr.msra.gmra.mrb[28].mxu0 %vm180_vm0, %v2927_v7 }
  0xcc   :  { %1046 = vmatprep.mubr.f32.mxu0 %v2716_v1  ;;  %1403 = vmatpush1.msra.mxu0 %v1394_v33 }
  0xcd   :  { %630 = vperm.xlu1 %2487, %v2948_v12   ;;  %1580 = vmatprep.subr.mxu0 %v1399_v35 }
  0xce   :  { %702 = vperm.xlu0 %2493, %v2948_v12   ;;  %2322 = vmatmul.mubr.msk.f32.vlgmr.msra.gmra.mrb[28].mxu1 %vm180_vm0, %v2927_v7 }
  0xcf   :  { %2309 = vmatmul.mubr.msk.f32.gmra.mrb[30].mxu0 %vm180_vm0, %v2941_v10  ;;  %1561 = vmatprep.mubr.f32.mxu1 %v2716_v1 }
  0xd0   :  { %1052 = vmatprep.mubr.f32.mxu0 %v2716_v1  ;;  %1670 = vmatpush1.msra.mxu1 %v1400_v23  ;;  %v2128_v23 = vld [vmem:[#allocation11 + $0x38] sm:$0xff] }
  0xd1   :  { %2490 = vset.pattern.permute.xlu1 %v3731_v30  ;;  %2437 = vmatprep.subr.bf16.mxu1 %v2725_v39 }
  0xd2   :  { %646 = vperm.xlu1 %2490, %v2941_v10   ;;  %2496 = vset.pattern.permute.xlu0 %v3725_v36 }
  0xd3   :  { %2310 = vmatmul.mubr.msk.f32.gmra.mrb[32].mxu0 %vm180_vm0, %v2932_v8  ;;  %718 = vperm.xlu0 %2496, %v2941_v10  }
  0xd4   :  { %1058 = vmatprep.mubr.f32.mxu0 %v2716_v1  ;;  %2323 = vmatmul.mubr.msk.f32.gmra.mrb[30].mxu1 %vm180_vm0, %v2941_v10 }
  0xd5   :  { %1567 = vmatprep.mubr.f32.mxu1 %v2716_v1 }
  0xd6   :  { %650 = vperm.xlu1 %2490, %v2932_v8  }
  0xd7   :  { %2311 = vmatmul.mubr.msk.f32.gmra.mrb[34].mxu0 %vm180_vm0, %v2948_v12  ;;  %777 = vrot.lane.b32.xlu0 %v2299_v37, %s2714_s28 }
  0xd8   :  { %1466 = vmatprep.mubr.f32.mxu0 %v2716_v1  ;;  %2507 = vset.pattern.permute.xlu0 %v3739_v25 }
  0xd9   :  { %2324 = vmatmul.mubr.msk.f32.gmra.mrb[32].mxu1 %vm180_vm0, %v2932_v8 }
  0xda   :  { %2491 = vset.pattern.permute.xlu1 %v3729_v32  ;;  %1573 = vmatprep.mubr.f32.mxu1 %v2716_v1 }
  0xdb   :  { %2318 = vmatmul.mubr.msk.f32.vlgmr.msra.gmra.mrb[36].mxu0 %vm180_vm0, %v2927_v7  ;;  %666 = vperm.xlu1 %2491, %v2927_v7  }
  0xdc   :  { %1472 = vmatprep.mubr.f32.mxu0 %v2716_v1  ;;  %1581 = vmatpush1.msra.mxu0 %v1398_v38 }
  0xdd   :  { %2425 = vmatprep.subr.bf16.mxu0 %v2725_v39  ;;  %2325 = vmatmul.mubr.msk.f32.gmra.mrb[34].mxu1 %vm180_vm0, %v2948_v12 }
  0xde   :  { %1733 = vmatprep.mubr.f32.mxu1 %v2716_v1 }
  0xdf   :  { %2319 = vmatmul.mubr.msk.f32.gmra.mrb[38].mxu0 %vm180_vm0, %v2941_v10  ;;  %674 = vperm.xlu1 %2491, %v2932_v8  }
  0xe0   :  { %1478 = vmatprep.mubr.f32.mxu0 %v2716_v1 }
  0xe1   :  { %2330 = vmatmul.mubr.msk.f32.vlgmr.msra.gmra.mrb[36].mxu1 %vm180_vm0, %v2927_v7 }
  0xe2   :  { %2439 = vmatpush3.bf16.msra.mxu1 %v2438_v31  ;;  %1739 = vmatprep.mubr.f32.mxu1 %v2716_v1 }
  0xe3   :  { %2320 = vmatmul.mubr.msk.f32.gmra.mrb[40].mxu0 %vm180_vm0, %v2932_v8  ;;  %678 = vperm.xlu1 %2491, %v2948_v12  }
  0xe4   :  { %1484 = vmatprep.mubr.f32.mxu0 %v2716_v1  ;;  %2440 = vmatprep.subr.bf16.mxu1 %v2725_v39 }
  0xe5   :  { %2331 = vmatmul.mubr.msk.f32.gmra.mrb[38].mxu1 %vm180_vm0, %v2941_v10 }
  0xe6   :  { %2442 = vmatpush3.bf16.msra.mxu1 %v2441_v47  ;;  %1745 = vmatprep.mubr.f32.mxu1 %v2716_v1 }
  0xe7   :  { %2321 = vmatmul.mubr.msk.f32.gmra.mrb[42].mxu0 %vm180_vm0, %v2948_v12  ;;  %2494 = vset.pattern.permute.xlu1 %v3727_v34 }
  0xe8   :  { %1644 = vmatprep.mubr.f32.mxu0 %v2716_v1  ;;  %694 = vperm.xlu1 %2494, %v2941_v10  }
  0xe9   :  { %2443 = vmatprep.subr.bf16.mxu1 %v2725_v39  ;;  %2332 = vmatmul.mubr.msk.f32.gmra.mrb[40].mxu1 %vm180_vm0, %v2932_v8 }
  0xea   :  { %1751 = vmatprep.mubr.f32.mxu1 %v2716_v1 }
  0xeb   :  { %2326 = vmatmul.mubr.msk.f32.vlgmr.msra.gmra.mrb[44].mxu0 %vm180_vm0, %v2927_v7 }
  0xec   :  { %2427 = vmatpush3.bf16.msra.mxu0 %v2426_v42  ;;  %1650 = vmatprep.mubr.f32.mxu0 %v2716_v1 }
  0xed   :  { %2428 = vmatprep.subr.bf16.mxu0 %v2725_v39  ;;  %698 = vperm.xlu1 %2494, %v2932_v8  }
  0xee   :  { %2333 = vmatmul.mubr.msk.f32.gmra.mrb[42].mxu1 %vm180_vm0, %v2948_v12 }
  0xef   :  { %2327 = vmatmul.mubr.msk.f32.gmra.mrb[46].mxu0 %vm180_vm0, %v2941_v10  ;;  %2422 = vmatprep.mubr.msk.f32.mxu1 %vm2726_vm2, %v2716_v1 }
  0xf0   :  { %2430 = vmatpush3.bf16.msra.mxu0 %v2429_v45  ;;  %1656 = vmatprep.mubr.f32.mxu0 %v2716_v1 }
  0xf1   :  { %2431 = vmatprep.subr.bf16.mxu0 %v2725_v39  ;;  %2495 = vset.pattern.permute.xlu1 %v3725_v36 }
  0xf2   :  { %714 = vperm.xlu1 %2495, %v2927_v7  }
  0xf3   :  { %2328 = vmatmul.mubr.msk.f32.gmra.mrb[48].mxu0 %vm180_vm0, %v2932_v8 }
  0xf4   :  { %2433 = vmatpush3.bf16.msra.mxu0 %v2432_v48  ;;  %1662 = vmatprep.mubr.f32.mxu0 %v2716_v1 }
  0xf5   :  { %2434 = vmatprep.subr.bf16.mxu0 %v2725_v39 }
  0xf6   :  { %722 = vperm.xlu1 %2495, %v2932_v8  }
  0xf7   :  { %2329 = vmatmul.mubr.msk.f32.gmra.mrb[50].mxu0 %vm180_vm0, %v2948_v12 }
  0xf8   :  { %2436 = vmatpush3.bf16.msra.mxu0 %v2435_v51  ;;  %2387 = vmatprep.mubr.msk.f32.mxu0 %vm2726_vm2, %v2716_v1 }
  0xfa   :  { %726 = vperm.xlu1 %2495, %v2948_v12  }
  0xfb   :  { %2388 = vmatmul.mubr.msk.f32.vlgmr.msra.gmra.mrb[52].mxu0 %vm2007_vm3, %v2950_v13 }
  0xfe   :  { %2497 = vset.pattern.permute.xlu1 %v3735_v2 }
  0xff   :  { %1382 = vrot.lane.b32.xlu1 %v2317_v52, %s2714_s28  ;;  %v2125_v52 = vld [vmem:[#allocation11 + $0x20] sm:$0xff] }
 0x114   :  { %v555_v53 = vpop.permute.xlu1 %554 }
 0x118   :  { %v3151_v54 = vpop.permute.xlu1 %558 }
 0x11c   :  { %v3153_v55 = vpop.permute.xlu1 %562 }
 0x121   :  { %v571_v56 = vpop.permute.xlu1 %570 }
 0x125   :  { %v575_v57 = vpop.permute.xlu1 %574 }
 0x126   :  { %v3175_v11 = vpop.xlane.xlu0 %163 }
 0x129   :  { %v3155_v58 = vpop.permute.xlu1 %578 }
 0x12d   :  { %v3157_v59 = vpop.permute.xlu1 %582 }
 0x12e   :  { %v551_v14 = vpop.permute.xlu0 %550 }
 0x132   :  { %v3159_v60 = vpop.permute.xlu1 %594 }
 0x134   :  { %v3187_v15 = vpop.permute.xlu0 %622 }
 0x136   :  { %v3161_v61 = vpop.permute.xlu1 %598 }
 0x139   :  { %v3195_v33 = vpop.permute.xlu0 %642 }
 0x13a   :  { %v3163_v62 = vpop.permute.xlu1 %602 }
 0x13e   :  { %v3165_v63 = vpop.permute.xlu1 %606 }
 0x143   :  { %v3167_v0 = vpop.permute.xlu1 %618 }
 0x147   :  { %v3169_v3 = vpop.permute.xlu1 %626 }
 0x14c   :  { %v3171_v4 = vpop.permute.xlu1 %630 }
 0x151   :  { %v3173_v6 = vpop.permute.xlu1 %646 }
 0x155   :  { %v3180_v13 = vpop.permute.xlu1 %650 }
 0x15a   :  { %v3190_v16 = vpop.permute.xlu1 %666 }
 0x15e   :  { %v3200_v38 = vpop.permute.xlu1 %674 }
 0x162   :  { %v3220_v10 = vpop.permute.xlu1 %678 }
 0x166   :  { %v259_v17 = vpop.f32.mrb[0].mxu0  ;;  %v360_v20 = vpop.f32.mrb[0].mxu1 }
 0x167   :  { %v261_v21 = vpop.f32.mrb[1].mxu0  ;;  %v565_v22 = vmul.f32 %v551_v14, %v259_v17  ;;  %v362_v28 = vpop.f32.mrb[1].mxu1 }
 0x168   :  { %v585_v29 = vmul.f32 %v571_v56, %v261_v21  ;;  %v635_v24 = vmul.f32 %v3169_v3, %v362_v28  ;;  %v2129_v28 = vld [vmem:[#allocation11 + $0x40] sm:$0xff] }
 0x169   :  { %v2450_v47 = vpack.c.bf16 %v2130_v43, %v2129_v28 }
 0x16a   :  { %v3198_v35 = vadd.f32 %v585_v29, %v565_v22  ;;  %v265_v37 = vpop.f32.mrb[2].mxu0  ;;  %v366_v41 = vpop.f32.mrb[2].mxu1  ;;  %v2127_v22 = vld [vmem:[#allocation11 + $0x30] sm:$0xff] }
 0x16b   :  { %v566_v40 = vmul.f32 %v555_v53, %v265_v37  ;;  %v267_v42 = vpop.f32.mrb[3].mxu0  ;;  %v368_v45 = vpop.f32.mrb[3].mxu1  ;;  %v2126_v53 = vld [vmem:[#allocation11 + $0x28] sm:$0xff]  ;;  %v2447_v8 = vpack.c.bf16 %v2128_v23, %v2127_v22  ;;  %v612_v31 = vmul.f32 %v3165_v63, %v366_v41  ;;  %v2133_v22 = vld [vmem:[#allocation11 + $0x60] sm:$0xff] }
 0x16c   :  { %v586_v46 = vmul.f32 %v575_v57, %v267_v42  ;;  %v3215_v57 = vpop.permute.xlu0 %654  ;;  %v2444_v9 = vpack.c.bf16 %v2126_v53, %v2125_v52  ;;  %v636_v44 = vmul.f32 %v3171_v4, %v368_v45  ;;  %v2132_v53 = vld [vmem:[#allocation11 + $0x58] sm:$0xff]  ;;  %v2134_v23 = vld [vmem:[#allocation11 + $0x68] sm:$0xff] }
 0x16e   :  { %v3206_v48 = vadd.f32 %v586_v46, %v566_v40  ;;  %v271_v49 = vpop.f32.mrb[4].mxu0  ;;  %v3211_v51 = vpop.f32.mrb[4].mxu1  ;;  %2445 = vmatpush3.bf16.msra.mxu1 %v2444_v9 }
 0x16f   :  { %v567_v7 = vmul.f32 %v3151_v54, %v271_v49  ;;  %v273_v50 = vpop.f32.mrb[5].mxu0  ;;  %v3217_v5 = vpop.f32.mrb[5].mxu1  ;;  %v611_v54 = vmul.f32 %v3163_v62, %v360_v20  ;;  %2446 = vmatprep.subr.bf16.mxu1 %v2725_v39 }
 0x170   :  { %v587_v56 = vmul.f32 %v3155_v58, %v273_v50  ;;  %v671_v29 = vpop.permute.xlu0 %670 }
 0x172   :  { %v591_v14 = vadd.f32 %v587_v56, %v567_v7  ;;  %v277_v17 = vpop.f32.mrb[6].mxu0  ;;  %v3226_v58 = vpop.f32.mrb[6].mxu1  ;;  %2448 = vmatpush3.bf16.msra.mxu1 %v2447_v8 }
 0x173   :  { %v568_v18 = vmul.f32 %v3153_v55, %v277_v17  ;;  %v279_v21 = vpop.f32.mrb[7].mxu0  ;;  %v3231_v20 = vpop.f32.mrb[7].mxu1  ;;  %2449 = vmatprep.subr.bf16.mxu1 %v2725_v39 }
 0x174   :  { %v615_v26 = vadd.f32 %v611_v54, %v591_v14  ;;  %v588_v62 = vmul.f32 %v3157_v59, %v279_v21  ;;  %v3234_v55 = vpop.permute.xlu1 %694  ;;  %v691_v7 = vpop.permute.xlu0 %690 }
 0x176   :  { %v592_v37 = vadd.f32 %v588_v62, %v568_v18  ;;  %v348_v40 = vpop.f32.mrb[8].mxu0  ;;  %v3237_v42 = vadd.f32 %v635_v24, %v615_v26  ;;  %v3246_v41 = vpop.f32.mrb[8].mxu1  ;;  %2451 = vmatpush3.bf16.msra.mxu1 %v2450_v47  ;;  %v2456_v26 = vpack.c.bf16 %v2134_v23, %v2133_v22 }
 0x177   :  { %v609_v3 = vmul.f32 %v3159_v60, %v348_v40  ;;  %v350_v59 = vpop.f32.mrb[9].mxu0  ;;  %v3250_v60 = vpop.f32.mrb[9].mxu1  ;;  %2452 = vmatprep.subr.bf16.mxu1 %v2725_v39 }
 0x178   :  { %v616_v46 = vadd.f32 %v612_v31, %v592_v37  ;;  %v633_v63 = vmul.f32 %v3167_v0, %v350_v59  ;;  %v699_v1 = vpop.permute.xlu1 %698  ;;  %v2131_v0 = vld [vmem:[#allocation11 + $0x50] sm:$0xff]  ;;  %v2136_v59 = vld [vmem:[#allocation11 + $0x78] sm:$0xff] }
 0x179   :  { %v613_v12 = vadd.f32 %v609_v3, %v3198_v35  ;;  %v2453_v35 = vpack.c.bf16 %v2132_v53, %v2131_v0 }
 0x17a   :  { %v354_v49 = vpop.f32.mrb[10].mxu0  ;;  %v3252_v50 = vadd.f32 %v636_v44, %v616_v46  ;;  %v3256_v9 = vpop.f32.mrb[10].mxu1 }
 0x17b   :  { %v637_v52 = vadd.f32 %v633_v63, %v613_v12  ;;  %v610_v4 = vmul.f32 %v3161_v61, %v354_v49  ;;  %v356_v45 = vpop.f32.mrb[11].mxu0  ;;  %v3260_v14 = vpop.f32.mrb[11].mxu1  ;;  %2454 = vmatpush3.bf16.msra.mxu1 %v2453_v35 }
 0x17c   :  { %v634_v56 = vmul.f32 %v3187_v15, %v356_v45  ;;  %v703_v15 = vpop.permute.xlu0 %702  ;;  %2455 = vmatprep.subr.bf16.mxu1 %v2725_v39  ;;  %v715_v62 = vpop.permute.xlu1 %714  ;;  %v707_v45 = vmul.f32 %v699_v1, %v3246_v41 }
 0x17d   :  { %v614_v54 = vadd.f32 %v610_v4, %v3206_v48  ;;  %v705_v48 = vmul.f32 %v691_v7, %v3211_v51  ;;  %v729_v44 = vmul.f32 %v715_v62, %v3217_v5  ;;  %v706_v51 = vmul.f32 %v3234_v55, %v3226_v58 }
 0x17e   :  { %v437_v17 = vpop.f32.mrb[12].mxu0  ;;  %v3282_v53 = vpop.f32.mrb[12].mxu1 }
 0x17f   :  { %v638_v18 = vadd.f32 %v634_v56, %v614_v54  ;;  %v657_v21 = vmul.f32 %v3195_v33, %v437_v17  ;;  %v439_v61 = vpop.f32.mrb[13].mxu0  ;;  %2457 = vmatpush3.bf16.msra.mxu1 %v2456_v26  ;;  %v2135_v33 = vld [vmem:[#allocation11 + $0x70] sm:$0xff]  ;;  %v3287_v17 = vpop.f32.mrb[13].mxu1 }
 0x180   :  { %v681_v24 = vmul.f32 %v3190_v16, %v439_v61  ;;  %v719_v43 = vpop.permute.xlu0 %718  ;;  %2458 = vmatprep.subr.bf16.mxu1 %v2725_v39  ;;  %v2459_v16 = vpack.c.bf16 %v2136_v59, %v2135_v33  ;;  %v723_v49 = vpop.permute.xlu1 %722 }
 0x181   :  { %v661_v8 = vadd.f32 %v657_v21, %v637_v52  ;;  %v730_v52 = vmul.f32 %v719_v43, %v3231_v20 }
 0x182   :  { %v443_v31 = vpop.f32.mrb[14].mxu0 }
 0x183   :  { %v685_v37 = vadd.f32 %v681_v24, %v661_v8  ;;  %v658_v40 = vmul.f32 %v3173_v6, %v443_v31  ;;  %v445_v3 = vpop.f32.mrb[15].mxu0  ;;  %v3274_v6 = vld [vmem:[%s3754_s0] ss:$0 sm:$0xff]  ;;  %2460 = vmatpush3.bf16.msra.mxu1 %v2459_v16  ;;  %v3295_v22 = vpop.f32.mrb[14].mxu1 }
 0x184   :  { %v682_v28 = vmul.f32 %v671_v29, %v445_v3  ;;  %v3300_v24 = vpop.f32.mrb[15].mxu1 }
 0x185   :  { %v709_v46 = vadd.f32 %v705_v48, %v685_v37  ;;  %v662_v63 = vadd.f32 %v658_v40, %v638_v18 }
 0x186   :  { %v449_v47 = vpop.f32.mrb[16].mxu0 }
 0x187   :  { %v733_v12 = vadd.f32 %v729_v44, %v709_v46  ;;  %v686_v29 = vadd.f32 %v682_v28, %v662_v63  ;;  %v659_v7 = vmul.f32 %v3180_v13, %v449_v47  ;;  %v451_v39 = vpop.f32.mrb[17].mxu0 }
 0x188   :  { %v683_v5 = vmul.f32 %v3200_v38, %v451_v39  ;;  %v731_v38 = vmul.f32 %v723_v49, %v3250_v60 }
 0x189   :  { %v744_v4 = vadd.f32 %v3274_v6, %v733_v12  ;;  %v663_v58 = vadd.f32 %v659_v7, %v3237_v42  ;;  %v710_v55 = vadd.f32 %v706_v51, %v686_v29  ;;  %v727_v42 = vpop.permute.xlu1 %726 }
 0x18a   :  { %v455_v0 = vpop.f32.mrb[18].mxu0  ;;  %v732_v48 = vmul.f32 %v727_v42, %v3260_v14 }
 0x18b   :  { %v3284_v56 = vmax.f32 %v744_v4, 0.0  ;;  %v687_v35 = vadd.f32 %v683_v5, %v663_v58  ;;  %v734_v13 = vadd.f32 %v730_v52, %v710_v55  ;;  %v660_v54 = vmul.f32 %v3215_v57, %v455_v0  ;;  %v457_v20 = vpop.f32.mrb[19].mxu0 }
 0x18c   :  { %v684_v18 = vmul.f32 %v3220_v10, %v457_v20  ;;  %v708_v57 = vmul.f32 %v703_v15, %v3256_v9 }
 0x18d   :  { %v711_v21 = vadd.f32 %v707_v45, %v687_v35  ;;  %v745_v41 = vadd.f32 %v3274_v6, %v734_v13  ;;  %v664_v1 = vadd.f32 %v660_v54, %v3252_v50  ;;  %1155 = vperm.xlu1 %2497, %v3284_v56   ;;  %v753_v61 = vrot.slane %v3284_v56, 4  ;;  %v3307_v50 = vpop.f32.mrb[16].mxu1 }
 0x18e   :  { %v3298_v23 = vpop.f32.mrb[20].mxu0  ;;  %v3310_v31 = vpop.f32.mrb[17].mxu1 }
 0x18f   :  { %v735_v60 = vadd.f32 %v731_v38, %v711_v21  ;;  %v3302_v10 = vmax.f32 %v745_v41, 0.0  ;;  %v688_v26 = vadd.f32 %v684_v18, %v664_v1  ;;  %v755_v62 = vadd.f32 %v753_v61, %v3284_v56  ;;  %v3305_v8 = vpop.f32.mrb[21].mxu0  ;;  %v3317_v3 = vpop.f32.mrb[18].mxu1 }
 0x190   :  { %v3326_v16 = vpop.f32.mrb[19].mxu1 }
 0x191   :  { %v746_v9 = vadd.f32 %v3274_v6, %v735_v60  ;;  %v712_v15 = vadd.f32 %v708_v57, %v688_v26  ;;  %2498 = vset.pattern.permute.xlu1 %v3737_v19  ;;  %1203 = vperm.xlu0 %2507, %v3302_v10   ;;  %v756_v37 = vadd.f32 %v755_v62, %v3302_v10  ;;  %v758_v40 = vrot.slane %v3302_v10, 4  ;;  %v3328_v44 = vpop.f32.mrb[20].mxu1 }
 0x192   :  { %1175 = vperm.xlu1 %2498, %v3284_v56   ;;  %v3320_v33 = vpop.f32.mrb[22].mxu0  ;;  %v3333_v51 = vpop.f32.mrb[21].mxu1 }
 0x193   :  { %v3322_v14 = vmax.f32 %v746_v9, 0.0  ;;  %v736_v59 = vadd.f32 %v732_v48, %v712_v15  ;;  %v760_v28 = vadd.f32 %v758_v40, %v756_v37  ;;  %v3324_v43 = vpop.f32.mrb[23].mxu0 }
 0x194   :  { %v3339_v12 = vpop.f32.mrb[22].mxu1 }
 0x195   :  { %2511 = vset.pattern.permute.xlu0 %v3727_v34  ;;  %v761_v46 = vadd.f32 %v760_v28, %v3322_v14  ;;  %v763_v63 = vrot.slane %v3322_v14, 4  ;;  %v3346_v7 = vpop.f32.mrb[23].mxu1  ;;  %v747_v39 = vadd.f32 %v3274_v6, %v736_v59 }
 0x196   :  { %2499 = vset.pattern.permute.xlu1 %v3739_v25  ;;  %1299 = vperm.xlu0 %2511, %v3302_v10   ;;  %v3337_v47 = vpop.f32.mrb[24].mxu0 }
 0x197   :  { %1199 = vperm.xlu1 %2499, %v3284_v56   ;;  %v3342_v49 = vadd.f32 %v763_v63, %v761_v46  ;;  %v3344_v29 = vpop.f32.mrb[25].mxu0  ;;  %v3357_v4 = vmax.f32 %v747_v39, 0.0  ;;  %v2336_v46 = vld [vmem:[%s3712_s14] ss:$0 sm:$0xff] }
 0x198   :  { %v3379_v13 = vpop.f32.mrb[24].mxu1 }
 0x199   :  { %v3381_v54 = vpop.f32.mrb[25].mxu1 }
 0x19a   :  { %2512 = vset.pattern.permute.xlu0 %v3725_v36  ;;  %v3350_v52 = vpop.f32.mrb[26].mxu0 }
 0x19b   :  { %2500 = vset.pattern.permute.xlu1 %v3733_v27  ;;  %1323 = vperm.xlu0 %2512, %v3302_v10   ;;  %v3354_v5 = vpop.f32.mrb[27].mxu0 }
 0x19c   :  { %1223 = vperm.xlu1 %2500, %v3284_v56   ;;  %v3384_v20 = vpop.f32.mrb[26].mxu1 }
 0x19d   :  { %v3390_v18 = vpop.f32.mrb[27].mxu1 }
 0x19e   :  { %v3359_v58 = vpop.f32.mrb[28].mxu0 }
 0x19f   :  { %2523 = vset.pattern.permute.xlu0 %v3739_v25  ;;  %v3362_v55 = vpop.f32.mrb[29].mxu0 }
 0x1a0   :  { %2501 = vset.pattern.permute.xlu1 %v3731_v30  ;;  %1211 = vperm.xlu0 %2523, %v3357_v4  }
 0x1a1   :  { %1247 = vperm.xlu1 %2501, %v3284_v56  }
 0x1a2   :  { %v3367_v6 = vpop.f32.mrb[30].mxu0 }
 0x1a3   :  { %v3369_v45 = vpop.f32.mrb[31].mxu0 }
 0x1a4   :  { %2526 = vset.pattern.permute.xlu0 %v3729_v32 }
 0x1a5   :  { %2502 = vset.pattern.permute.xlu1 %v3729_v32  ;;  %1283 = vperm.xlu0 %2526, %v3357_v4  }
 0x1a6   :  { %1271 = vperm.xlu1 %2502, %v3284_v56   ;;  %v3375_v0 = vpop.f32.mrb[32].mxu0 }
 0x1a7   :  { %v3377_v35 = vpop.f32.mrb[33].mxu0 }
 0x1a9   :  { %2528 = vset.pattern.permute.xlu0 %v3725_v36 }
 0x1aa   :  { %2503 = vset.pattern.permute.xlu1 %v3727_v34  ;;  %1331 = vperm.xlu0 %2528, %v3357_v4   ;;  %v3388_v38 = vpop.f32.mrb[34].mxu0 }
 0x1ab   :  { %1295 = vperm.xlu1 %2503, %v3284_v56   ;;  %v3393_v42 = vpop.f32.mrb[35].mxu0 }
 0x1ae   :  { %v3395_v21 = vpop.f32.mrb[36].mxu0  ;;  %2530 = vset.pattern.permute.xlu0 %v3737_v19 }
 0x1af   :  { %2504 = vset.pattern.permute.xlu1 %v3725_v36  ;;  %v3399_v41 = vpop.f32.mrb[37].mxu0 }
 0x1b0   :  { %1319 = vperm.xlu1 %2504, %v3284_v56  }
 0x1b2   :  { %v3402_v1 = vpop.f32.mrb[38].mxu0 }
 0x1b3   :  { %v3404_v61 = vpop.f32.mrb[39].mxu0 }
 0x1b4   :  { %2505 = vset.pattern.permute.xlu1 %v3735_v2 }
 0x1b5   :  { %1159 = vperm.xlu1 %2505, %v3302_v10  }
 0x1b6   :  { %v3408_v57 = vpop.f32.mrb[40].mxu0 }
 0x1b7   :  { %3755 = vst [vmem:[#allocation17_spill] sm:$0xff] %v3408_v57  ;;  %v3410_v60 = vpop.f32.mrb[41].mxu0 }
 0x1b8   :  { %3756 = vst [vmem:[#allocation18_spill] sm:$0xff] %v3410_v60 }
 0x1b9   :  { %2506 = vset.pattern.permute.xlu1 %v3737_v19 }
 0x1ba   :  { %1179 = vperm.xlu1 %2506, %v3302_v10   ;;  %v3414_v26 = vpop.f32.mrb[42].mxu0 }
 0x1bb   :  { %3757 = vst [vmem:[#allocation19_spill] sm:$0xff] %v3414_v26  ;;  %v3416_v62 = vpop.f32.mrb[43].mxu0 }
 0x1bc   :  { %3758 = vst [vmem:[#allocation20_spill] sm:$0xff] %v3416_v62  ;;  %v3770_v62 = vmov 0  }
 0x1be   :  { %2508 = vset.pattern.permute.xlu1 %v3733_v27  ;;  %v3419_v56 = vpop.f32.mrb[44].mxu0 }
 0x1bf   :  { %1227 = vperm.xlu1 %2508, %v3302_v10   ;;  %v3422_v48 = vpop.f32.mrb[45].mxu0 }
 0x1c2   :  { %v3424_v9 = vpop.f32.mrb[46].mxu0 }
 0x1c3   :  { %3759 = vst [vmem:[#allocation21_spill] sm:$0xff] %v3424_v9  ;;  %2509 = vset.pattern.permute.xlu1 %v3731_v30  ;;  %v3427_v15 = vpop.f32.mrb[47].mxu0 }
 0x1c4   :  { %3760 = vst [vmem:[#allocation22_spill] sm:$0xff] %v3427_v15  ;;  %1251 = vperm.xlu1 %2509, %v3302_v10  }
 0x1c6   :  { %v3430_v37 = vpop.f32.mrb[48].mxu0 }
 0x1c7   :  { %3761 = vst [vmem:[#allocation23_spill] sm:$0xff] %v3430_v37  ;;  %v3432_v40 = vpop.f32.mrb[49].mxu0 }
 0x1c8   :  { %3762 = vst [vmem:[#allocation24_spill] sm:$0xff] %v3432_v40  ;;  %2510 = vset.pattern.permute.xlu1 %v3729_v32 }
 0x1c9   :  { %1275 = vperm.xlu1 %2510, %v3302_v10  }
 0x1ca   :  { %v3436_v59 = vpop.f32.mrb[50].mxu0 }
 0x1cb   :  { %3763 = vst [vmem:[#allocation25_spill] sm:$0xff] %v3436_v59  ;;  %v3438_v28 = vpop.f32.mrb[51].mxu0  ;;  %v3765_v59 = vmov 3  }
 0x1cc   :  { %3764 = vst [vmem:[#allocation26_spill] sm:$0xff] %v3438_v28 }
 0x1cd   :  { %2513 = vset.pattern.permute.xlu1 %v3735_v2 }
 0x1ce   :  { %v2077_v63 = vpop.f32.mrb[52].mxu0  ;;  %1163 = vperm.xlu1 %2513, %v3322_v14  }
 0x1cf   :  { %v2078_v39 = vadd.f32 %v2336_v46, %v2077_v63  ;;  %v2389_v36 = vpop.f32.mrb[53].mxu0  ;;  %v3766_v63 = vmov 4  }
 0x1d1   :  { %v2082_v34 = vsel %vm2081_vm4, %v2078_v39, 0.0 }
 0x1d2   :  { %v2083_v32 = vrot.slane %v2082_v34, 4  ;;  %2514 = vset.pattern.permute.xlu1 %v3737_v19 }
 0x1d3   :  { %1183 = vperm.xlu1 %2514, %v3322_v14  }
 0x1d4   :  { %v2084_v10 = vadd.f32 %v2083_v32, %v2082_v34 }
 0x1d6   :  { %v2085_v30 = vrot.slane %v2084_v10, 2 }
 0x1d7   :  { %2515 = vset.pattern.permute.xlu1 %v3739_v25  ;;  %v3767_v25 = vmov 5  }
 0x1d8   :  { %v2086_v27 = vadd.f32 %v2085_v30, %v2084_v10  ;;  %1207 = vperm.xlu1 %2515, %v3322_v14   ;;  %v3768_v10 = vmov 6  }
 0x1da   :  { %v2087_v2 = vrot.slane %v2086_v27, 1 }
 0x1dc   :  { %v2088_v28 = vadd.f32 %v2087_v2, %v2086_v27  ;;  %2516 = vset.pattern.permute.xlu1 %v3765_v59 }
 0x1dd   :  { %1231 = vperm.xlu1 %2516, %v3322_v14  }
 0x1de   :  { %v2090_v36 = vmul.f32 0.25, %v2088_v28 }
 0x1e0   :  { %v2091_v46 = vsub.f32 %v2078_v39, %v2090_v36  ;;  %v3769_v36 = vmov 7  }
 0x1e1   :  { %2517 = vset.pattern.permute.xlu1 %v3766_v63 }
 0x1e2   :  { %v2092_v19 = vmul.f32 %v2091_v46, %v2091_v46  ;;  %1255 = vperm.xlu1 %2517, %v3322_v14  }
 0x1e4   :  { %v2093_v32 = vsel %vm2081_vm4, %v2092_v19, 0.0 }
 0x1e5   :  { %v2094_v34 = vrot.slane %v2093_v32, 4 }
 0x1e6   :  { %2518 = vset.pattern.permute.xlu1 %v3767_v25 }
 0x1e7   :  { %v2095_v30 = vadd.f32 %v2094_v34, %v2093_v32  ;;  %1279 = vperm.xlu1 %2518, %v3322_v14   ;;  %v3771_v32 = vmov 1  }
 0x1e9   :  { %v2096_v2 = vrot.slane %v2095_v30, 2 }
 0x1eb   :  { %v2097_v27 = vadd.f32 %v2096_v2, %v2095_v30  ;;  %2519 = vset.pattern.permute.xlu1 %v3768_v10  ;;  %v2338_v30 = vld [vmem:[%s3713_s15] ss:$0 sm:$0xff]  ;;  %s2727_s15 = smov 120  }
 0x1ec   :  { %1303 = vperm.xlu1 %2519, %v3322_v14  }
 0x1ed   :  { %v2098_v28 = vrot.slane %v2097_v27, 1 }
 0x1ef   :  { %v2099_v39 = vadd.f32 %v2098_v28, %v2097_v27  ;;  %v766_v27 = vadd.f32 %v3342_v49, %v3357_v4  ;;  %v768_v28 = vrot.slane %v3357_v4, 4 }
 0x1f0   :  { %2520 = vset.pattern.permute.xlu1 %v3769_v36 }
 0x1f1   :  { %v2100_v26 = vmul.f32 0.25, %v2099_v39  ;;  %1327 = vperm.xlu1 %2520, %v3322_v14   ;;  %v2339_v14 = vld [vmem:[%s3714_s16] ss:$0 sm:$0xff]  ;;  %v770_v40 = vadd.f32 %v768_v28, %v766_v27 }
 0x1f3   :  { %v2101_v19 = vadd.f32 1e-05, %v2100_v26 }
 0x1f5   :  { %2560 = vrsqrt.f32 %v2101_v19  ;;  %2521 = vset.pattern.permute.xlu1 %v3770_v62 }
 0x1f6   :  { %1167 = vperm.xlu1 %2521, %v3357_v4  }
 0x1fa   :  { %2522 = vset.pattern.permute.xlu1 %v3771_v32 }
 0x1fb   :  { %1187 = vperm.xlu1 %2522, %v3357_v4  }
 0x1ff   :  { %v2561_v34 = vpop.eup %2560  ;;  %2524 = vset.pattern.permute.xlu1 %v3765_v59 }
 0x200   :  { %v2103_v2 = vmul.f32 %v2561_v34, %v2091_v46  ;;  %1235 = vperm.xlu1 %2524, %v3357_v4   ;;  %v3478_v46 = vpop.permute.xlu1 %1382  ;;  %v778_v34 = vpop.permute.xlu0 %777 }
 0x202   :  { %v2111_v26 = vmul.f32 %v2338_v30, %v2103_v2  ;;  %v780_v30 = vmul.f32 %v778_v34, %v770_v40 }
 0x204   :  { %v2119_v39 = vadd.f32 %v2339_v14, %v2111_v26  ;;  %2525 = vset.pattern.permute.xlu1 %v3766_v63 }
 0x205   :  { %1259 = vperm.xlu1 %2525, %v3357_v4  }
 0x206   :  { %v2120_v19 = vmax.f32 %v2119_v39, 0.0 }
 0x208   :  { %2423 = vmatmul.mubr.f32.vlgmr.msra.gmra.mrb[44].mxu1 %v2120_v19 }
 0x209   :  { %2527 = vset.pattern.permute.xlu1 %v3768_v10 }
 0x20a   :  { %1307 = vperm.xlu1 %2527, %v3357_v4  }
 0x20c   :  { %v1156_v2 = vpop.permute.xlu1 %1155 }
 0x20d   :  { %v1170_v14 = vmul.f32 %v1156_v2, %v3298_v23 }
 0x20e   :  { %782 = vrot.lane.b32.xlu1 %v780_v30, %s2727_s15 }
 0x20f   :  { %2529 = vset.pattern.permute.xlu1 %v3770_v62 }
 0x211   :  { %v1176_v49 = vpop.permute.xlu1 %1175 }
 0x212   :  { %v1190_v26 = vmul.f32 %v1176_v49, %v3305_v8 }
 0x214   :  { %v1194_v27 = vadd.f32 %v1190_v26, %v1170_v14 }
 0x216   :  { %v1200_v28 = vpop.permute.xlu1 %1199 }
 0x217   :  { %v1214_v39 = vmul.f32 %v1200_v28, %v3282_v53 }
 0x219   :  { %v1218_v19 = vadd.f32 %v1214_v39, %v1194_v27  ;;  %v3772_v27 = vmov 2  }
 0x21b   :  { %v1224_v37 = vpop.permute.xlu1 %1223 }
 0x21c   :  { %v1238_v4 = vmul.f32 %v1224_v37, %v3287_v17  ;;  %v3495_v17 = vld [vmem:[%s3706_s8] ss:$0 sm:$0xff] }
 0x21e   :  { %v1242_v40 = vadd.f32 %v1238_v4, %v1218_v19 }
 0x220   :  { %v1248_v34 = vpop.permute.xlu1 %1247 }
 0x221   :  { %v1262_v60 = vmul.f32 %v1248_v34, %v3359_v58 }
 0x223   :  { %v1266_v30 = vadd.f32 %v1262_v60, %v1242_v40 }
 0x225   :  { %v1272_v57 = vpop.permute.xlu1 %1271 }
 0x226   :  { %v1286_v15 = vmul.f32 %v1272_v57, %v3362_v55  ;;  %v3501_v55 = vpop.f32.mrb[28].mxu1 }
 0x227   :  { %v3508_v28 = vpop.f32.mrb[29].mxu1 }
 0x228   :  { %v1290_v9 = vadd.f32 %v1286_v15, %v1266_v30  ;;  %v3516_v30 = vpop.f32.mrb[30].mxu1 }
 0x22a   :  { %v1296_v23 = vpop.permute.xlu1 %1295 }
 0x22b   :  { %v1310_v8 = vmul.f32 %v1296_v23, %v3328_v44  ;;  %v1204_v44 = vpop.permute.xlu0 %1203 }
 0x22c   :  { %v1215_v15 = vmul.f32 %v1204_v44, %v3295_v22 }
 0x22d   :  { %v1314_v2 = vadd.f32 %v1310_v8, %v1290_v9  ;;  %v3518_v8 = vpop.f32.mrb[31].mxu1 }
 0x22f   :  { %v1320_v49 = vpop.permute.xlu1 %1319 }
 0x230   :  { %v1334_v53 = vmul.f32 %v1320_v49, %v3333_v51 }
 0x232   :  { %v1338_v37 = vadd.f32 %v1334_v53, %v1314_v2 }
 0x234   :  { %v1349_v58 = vadd.f32 %v3495_v17, %v1338_v37  ;;  %v1160_v60 = vpop.permute.xlu1 %1159 }
 0x235   :  { %v1171_v9 = vmul.f32 %v1160_v60, %v3320_v33 }
 0x236   :  { %v3498_v14 = vmax.f32 %v1349_v58, 0.0 }
 0x238   :  { %1759 = vperm.xlu1 %2529, %v3498_v14  }
 0x239   :  { %v1180_v57 = vpop.permute.xlu1 %1179 }
 0x23a   :  { %v1191_v51 = vmul.f32 %v1180_v57, %v3324_v43  ;;  %v1300_v43 = vpop.permute.xlu0 %1299 }
 0x23b   :  { %v1311_v49 = vmul.f32 %v1300_v43, %v3339_v12 }
 0x23c   :  { %v1195_v26 = vadd.f32 %v1191_v51, %v1171_v9  ;;  %2531 = vset.pattern.permute.xlu1 %v3772_v27 }
 0x23d   :  { %1803 = vperm.xlu1 %2531, %v3498_v14  }
 0x23e   :  { %v1228_v39 = vpop.permute.xlu1 %1227  ;;  %v1219_v19 = vadd.f32 %v1215_v15, %v1195_v26  ;;  %v1324_v2 = vpop.permute.xlu0 %1323 }
 0x23f   :  { %v1239_v4 = vmul.f32 %v1228_v39, %v3300_v24  ;;  %v1335_v37 = vmul.f32 %v1324_v2, %v3346_v7 }
 0x241   :  { %v1243_v40 = vadd.f32 %v1239_v4, %v1219_v19  ;;  %2532 = vset.pattern.permute.xlu1 %v3765_v59 }
 0x242   :  { %1827 = vperm.xlu1 %2532, %v3498_v14  }
 0x243   :  { %v1252_v33 = vpop.permute.xlu1 %1251 }
 0x244   :  { %v1263_v22 = vmul.f32 %v1252_v33, %v3367_v6  ;;  %v3524_v6 = vpop.f32.mrb[32].mxu1 }
 0x245   :  { %v3527_v44 = vpop.f32.mrb[33].mxu1 }
 0x246   :  { %v1267_v34 = vadd.f32 %v1263_v22, %v1243_v40  ;;  %2533 = vset.pattern.permute.xlu1 %v3766_v63  ;;  %v3529_v57 = vpop.f32.mrb[34].mxu1 }
 0x247   :  { %1851 = vperm.xlu1 %2533, %v3498_v14  }
 0x248   :  { %v1276_v23 = vpop.permute.xlu1 %1275 }
 0x249   :  { %v1287_v24 = vmul.f32 %v1276_v23, %v3369_v45  ;;  %v3531_v45 = vpop.f32.mrb[35].mxu1 }
 0x24a   :  { %v3534_v12 = vpop.f32.mrb[36].mxu1 }
 0x24b   :  { %v1291_v53 = vadd.f32 %v1287_v24, %v1267_v34  ;;  %2534 = vset.pattern.permute.xlu1 %v3767_v25  ;;  %v3537_v51 = vpop.f32.mrb[37].mxu1 }
 0x24c   :  { %1875 = vperm.xlu1 %2534, %v3498_v14   ;;  %v3539_v26 = vpop.f32.mrb[38].mxu1 }
 0x24d   :  { %v1315_v58 = vadd.f32 %v1311_v49, %v1291_v53  ;;  %v1164_v60 = vpop.permute.xlu1 %1163  ;;  %v3546_v40 = vpop.f32.mrb[39].mxu1 }
 0x24e   :  { %v1172_v7 = vmul.f32 %v1164_v60, %v3337_v47  ;;  %v3548_v43 = vpop.f32.mrb[40].mxu1 }
 0x24f   :  { %v1339_v9 = vadd.f32 %v1335_v37, %v1315_v58  ;;  %v3551_v34 = vpop.f32.mrb[41].mxu1 }
 0x250   :  { %2535 = vset.pattern.permute.xlu1 %v3768_v10  ;;  %v3555_v47 = vpop.f32.mrb[42].mxu1 }
 0x251   :  { %1899 = vperm.xlu1 %2535, %v3498_v14   ;;  %v1350_v19 = vadd.f32 %v3495_v17, %v1339_v9  ;;  %v3558_v24 = vpop.f32.mrb[43].mxu1 }
 0x252   :  { %v1184_v15 = vpop.permute.xlu1 %1183 }
 0x253   :  { %v1192_v39 = vmul.f32 %v1184_v15, %v3344_v29  ;;  %v3553_v23 = vmax.f32 %v1350_v19, 0.0 }
 0x255   :  { %v1196_v4 = vadd.f32 %v1192_v39, %v1172_v7  ;;  %2536 = vset.pattern.permute.xlu1 %v3769_v36 }
 0x256   :  { %1923 = vperm.xlu1 %2536, %v3498_v14  }
 0x257   :  { %v1208_v33 = vpop.permute.xlu1 %1207 }
 0x258   :  { %v1216_v22 = vmul.f32 %v1208_v33, %v3307_v50 }
 0x25a   :  { %v1220_v29 = vadd.f32 %v1216_v22, %v1196_v4  ;;  %2537 = vset.pattern.permute.xlu1 %v3770_v62 }
 0x25b   :  { %1763 = vperm.xlu1 %2537, %v3553_v23  }
 0x25c   :  { %v1232_v2 = vpop.permute.xlu1 %1231 }
 0x25d   :  { %v1240_v49 = vmul.f32 %v1232_v2, %v3310_v31 }
 0x25f   :  { %v1244_v53 = vadd.f32 %v1240_v49, %v1220_v29  ;;  %2539 = vset.pattern.permute.xlu1 %v3765_v59  ;;  %v1212_v29 = vpop.permute.xlu0 %1211 }
 0x260   :  { %1831 = vperm.xlu1 %2539, %v3553_v23  }
 0x261   :  { %v1256_v50 = vpop.permute.xlu1 %1255 }
 0x262   :  { %v1264_v37 = vmul.f32 %v1256_v50, %v3375_v0 }
 0x264   :  { %v1268_v58 = vadd.f32 %v1264_v37, %v1244_v53  ;;  %2540 = vset.pattern.permute.xlu1 %v3766_v63  ;;  %v1217_v53 = vmul.f32 %v1212_v29, %v3317_v3 }
 0x265   :  { %1855 = vperm.xlu1 %2540, %v3553_v23  }
 0x266   :  { %v1280_v60 = vpop.permute.xlu1 %1279 }
 0x267   :  { %v1288_v9 = vmul.f32 %v1280_v60, %v3377_v35 }
 0x269   :  { %v1292_v15 = vadd.f32 %v1288_v9, %v1268_v58  ;;  %2542 = vset.pattern.permute.xlu1 %v3768_v10  ;;  %v1284_v9 = vpop.permute.xlu0 %1283 }
 0x26a   :  { %1903 = vperm.xlu1 %2542, %v3553_v23   ;;  %v1289_v3 = vmul.f32 %v1284_v9, %v3393_v42 }
 0x26b   :  { %v1304_v31 = vpop.permute.xlu1 %1303 }
 0x26c   :  { %v1312_v7 = vmul.f32 %v1304_v31, %v3379_v13 }
 0x26d   :  { %v1332_v31 = vpop.permute.xlu0 %1331 }
 0x26e   :  { %v1316_v39 = vadd.f32 %v1312_v7, %v1292_v15  ;;  %2543 = vset.pattern.permute.xlu1 %v3769_v36 }
 0x26f   :  { %1927 = vperm.xlu1 %2543, %v3553_v23  }
 0x270   :  { %v1328_v0 = vpop.permute.xlu1 %1327 }
 0x271   :  { %v1336_v19 = vmul.f32 %v1328_v0, %v3381_v54 }
 0x273   :  { %v1340_v4 = vadd.f32 %v1336_v19, %v1316_v39  ;;  %2544 = vset.pattern.permute.xlu1 %v3770_v62 }
 0x275   :  { %v1351_v35 = vadd.f32 %v3495_v17, %v1340_v4  ;;  %v1168_v33 = vpop.permute.xlu1 %1167 }
 0x276   :  { %v1173_v2 = vmul.f32 %v1168_v33, %v3350_v52 }
 0x277   :  { %v3576_v22 = vmax.f32 %v1351_v35, 0.0 }
 0x279   :  { %1767 = vperm.xlu1 %2544, %v3576_v22   ;;  %v1368_v29 = vrot.slane %v3576_v22, 4 }
 0x27a   :  { %v1188_v13 = vpop.permute.xlu1 %1187 }
 0x27b   :  { %v1193_v49 = vmul.f32 %v1188_v13, %v3354_v5 }
 0x27d   :  { %v1197_v50 = vadd.f32 %v1193_v49, %v1173_v2  ;;  %2547 = vset.pattern.permute.xlu1 %v3765_v59 }
 0x27e   :  { %1835 = vperm.xlu1 %2547, %v3576_v22  }
 0x27f   :  { %v1236_v54 = vpop.permute.xlu1 %1235  ;;  %v1221_v37 = vadd.f32 %v1217_v53, %v1197_v50 }
 0x280   :  { %v1241_v58 = vmul.f32 %v1236_v54, %v3326_v16  ;;  %v1337_v16 = vmul.f32 %v1332_v31, %v3390_v18 }
 0x282   :  { %v1245_v60 = vadd.f32 %v1241_v58, %v1221_v37  ;;  %2552 = vset.pattern.permute.xlu1 %v3769_v36 }
 0x283   :  { %1931 = vperm.xlu1 %2552, %v3576_v22  }
 0x284   :  { %v1260_v52 = vpop.permute.xlu1 %1259 }
 0x285   :  { %v1265_v5 = vmul.f32 %v1260_v52, %v3388_v38 }
 0x287   :  { %v1269_v15 = vadd.f32 %v1265_v5, %v1245_v60  ;;  %2553 = vset.pattern.permute.xlu1 %v3771_v32 }
 0x289   :  { %v1308_v7 = vpop.permute.xlu1 %1307  ;;  %v1293_v39 = vadd.f32 %v1289_v3, %v1269_v15 }
 0x28a   :  { %v1313_v0 = vmul.f32 %v1308_v7, %v3384_v20  ;;  %v1358_v20 = vrot.slane %v3498_v14, 4 }
 0x28c   :  { %v1317_v19 = vadd.f32 %v1313_v0, %v1293_v39  ;;  %v1360_v18 = vadd.f32 %v1358_v20, %v3498_v14  ;;  %v2281_v0 = vld [vmem:[#allocation2] ss:$0 sm:$0xff] }
 0x28d   :  { %v783_v4 = vpop.permute.xlu1 %782 }
 0x28e   :  { %v1341_v35 = vadd.f32 %v1337_v16, %v1317_v19  ;;  %v786_v33 = vsel %vm785_vm5, %v783_v4, 0.0  ;;  %v171_v19 = vadd.f32 %v2281_v0, %v3175_v11 }
 0x28f   :  { %787 = vadd.xlane.f32.xlu0 %v786_v33 }
 0x290   :  { %v1352_v38 = vadd.f32 %v3495_v17, %v1341_v35  ;;  %v1363_v17 = vrot.slane %v3553_v23, 4 }
 0x292   :  { %v1356_v42 = vmax.f32 %v1352_v38, 0.0 }
 0x294   :  { %1791 = vperm.xlu1 %2553, %v1356_v42   ;;  %v1373_v13 = vrot.slane %v1356_v42, 4 }
 0x298   :  { %2554 = vset.pattern.permute.xlu1 %v3772_v27 }
 0x299   :  { %1815 = vperm.xlu1 %2554, %v1356_v42  }
 0x29d   :  { %2555 = vset.pattern.permute.xlu1 %v3765_v59  ;;  %v1361_v59 = vadd.f32 %v1360_v18, %v3553_v23 }
 0x29e   :  { %1839 = vperm.xlu1 %2555, %v1356_v42  }
 0x2a2   :  { %2556 = vset.pattern.permute.xlu1 %v3766_v63 }
 0x2a3   :  { %1863 = vperm.xlu1 %2556, %v1356_v42  }
 0x2a5   :  { %1779 = vperm.xlu0 %2530, %v3498_v14  }
 0x2a7   :  { %2557 = vset.pattern.permute.xlu1 %v3767_v25 }
 0x2a8   :  { %1887 = vperm.xlu1 %2557, %v1356_v42  }
 0x2a9   :  { %1783 = vperm.xlu0 %2530, %v3553_v23  }
 0x2ac   :  { %2558 = vset.pattern.permute.xlu1 %v3769_v36 }
 0x2ad   :  { %2538 = vset.pattern.permute.xlu0 %v3772_v27  ;;  %1935 = vperm.xlu1 %2558, %v1356_v42  }
 0x2ae   :  { %1807 = vperm.xlu0 %2538, %v3553_v23  }
 0x2b2   :  { %2541 = vset.pattern.permute.xlu0 %v3767_v25 }
 0x2b3   :  { %1879 = vperm.xlu0 %2541, %v3553_v23  }
 0x2b7   :  { %2545 = vset.pattern.permute.xlu0 %v3771_v32  ;;  %v1365_v32 = vadd.f32 %v1363_v17, %v1361_v59  ;;  %v1760_v53 = vpop.permute.xlu1 %1759 }
 0x2b8   :  { %1787 = vperm.xlu0 %2545, %v3576_v22   ;;  %v1774_v59 = vmul.f32 %v1760_v53, %v3395_v21 }
 0x2bc   :  { %2546 = vset.pattern.permute.xlu0 %v3772_v27  ;;  %v1366_v27 = vadd.f32 %v1365_v32, %v3576_v22 }
 0x2bd   :  { %1811 = vperm.xlu0 %2546, %v3576_v22  }
 0x2c1   :  { %2548 = vset.pattern.permute.xlu0 %v3766_v63  ;;  %v1370_v63 = vadd.f32 %v1368_v29, %v1366_v27 }
 0x2c2   :  { %1859 = vperm.xlu0 %2548, %v3576_v22  }
 0x2c3   :  { %v1371_v14 = vadd.f32 %v1370_v63, %v1356_v42 }
 0x2c5   :  { %v1375_v23 = vadd.f32 %v1373_v13, %v1371_v14 }
 0x2c6   :  { %2549 = vset.pattern.permute.xlu0 %v3767_v25 }
 0x2c7   :  { %1883 = vperm.xlu0 %2549, %v3576_v22   ;;  %v1385_v25 = vmul.f32 %v3478_v46, %v1375_v23 }
 0x2cb   :  { %2550 = vset.pattern.permute.xlu0 %v3770_v62  ;;  %v1804_v62 = vpop.permute.xlu1 %1803 }
 0x2cc   :  { %1771 = vperm.xlu0 %2550, %v1356_v42   ;;  %v1818_v27 = vmul.f32 %v1804_v62, %v3501_v55 }
 0x2cf   :  { %v1828_v50 = vpop.permute.xlu1 %1827 }
 0x2d0   :  { %2551 = vset.pattern.permute.xlu0 %v3768_v10  ;;  %v2340_v10 = vld [vmem:[%s3716_s18] ss:$0 sm:$0xff]  ;;  %v1842_v63 = vmul.f32 %v1828_v50, %v3508_v28 }
 0x2d1   :  { %1907 = vperm.xlu0 %2551, %v3576_v22  }
 0x2d3   :  { %v1852_v54 = vpop.permute.xlu1 %1851 }
 0x2d5   :  { %1911 = vperm.xlu0 %2551, %v1356_v42  }
 0x2d7   :  { %v1876_v37 = vpop.permute.xlu1 %1875 }
 0x2d9   :  { %1387 = vrot.lane.b32.xlu0 %v1385_v25, %s2727_s15 }
 0x2da   :  { %2559 = vset.pattern.permute.xlu0 %v3769_v36 }
 0x2db   :  { %v2210_v2 = vpop.f32.mrb[44].mxu1  ;;  %v1900_v58 = vpop.permute.xlu1 %1899 }
 0x2dc   :  { %v2424_v49 = vpop.f32.mrb[45].mxu1  ;;  %v2211_v22 = vadd.f32 %v2340_v10, %v2210_v2  ;;  %v1914_v28 = vmul.f32 %v1900_v58, %v3534_v12  ;;  %v3774_v12 = vld [vmem:[#allocation22_spill] sm:$0xff] }
 0x2dd   :  { %v1866_v49 = vmul.f32 %v1852_v54, %v3419_v56  ;;  %v3773_v54 = vld [vmem:[#allocation21_spill] sm:$0xff] }
 0x2de   :  { %v2214_v60 = vsel %vm2081_vm4, %v2211_v22, 0.0 }
 0x2df   :  { %v2215_v46 = vrot.slane %v2214_v60, 4  ;;  %v1924_v9 = vpop.permute.xlu1 %1923 }
 0x2e1   :  { %v2216_v52 = vadd.f32 %v2215_v46, %v2214_v60 }
 0x2e3   :  { %v2217_v5 = vrot.slane %v2216_v52, 2  ;;  %v1764_v36 = vpop.permute.xlu1 %1763 }
 0x2e4   :  { %v1775_v13 = vmul.f32 %v1764_v36, %v3402_v1 }
 0x2e5   :  { %v2218_v3 = vadd.f32 %v2217_v5, %v2216_v52 }
 0x2e7   :  { %v1832_v15 = vpop.permute.xlu1 %1831  ;;  %v2219_v31 = vrot.slane %v2218_v3, 1 }
 0x2e8   :  { %v1843_v1 = vmul.f32 %v1832_v15, %v3518_v8 }
 0x2e9   :  { %v2220_v7 = vadd.f32 %v2219_v31, %v2218_v3 }
 0x2eb   :  { %v1856_v39 = vpop.permute.xlu1 %1855  ;;  %v2221_v16 = vmul.f32 0.25, %v2220_v7 }
 0x2ec   :  { %v1867_v5 = vmul.f32 %v1856_v39, %v3773_v54 }
 0x2ed   :  { %v3632_v38 = vsub.f32 %v2211_v22, %v2221_v16 }
 0x2ef   :  { %v1904_v35 = vpop.permute.xlu1 %1903  ;;  %v2223_v42 = vmul.f32 %v3632_v38, %v3632_v38 }
 0x2f1   :  { %v2224_v32 = vsel %vm2081_vm4, %v2223_v42, 0.0 }
 0x2f2   :  { %v2225_v23 = vrot.slane %v2224_v32, 4 }
 0x2f3   :  { %v1928_v20 = vpop.permute.xlu1 %1927 }
 0x2f4   :  { %v2226_v10 = vadd.f32 %v2225_v23, %v2224_v32  ;;  %v1939_v16 = vmul.f32 %v1928_v20, %v3546_v40 }
 0x2f6   :  { %v2227_v52 = vrot.slane %v2226_v10, 2 }
 0x2f8   :  { %v1768_v11 = vpop.permute.xlu1 %1767  ;;  %v2228_v8 = vadd.f32 %v2227_v52, %v2226_v10 }
 0x2fd   :  { %v1836_v22 = vpop.permute.xlu1 %1835 }
 0x2fe   :  { %v1844_v40 = vmul.f32 %v1836_v22, %v3527_v44  ;;  %v3779_v44 = vld [vmem:[#allocation20_spill] sm:$0xff] }
 0x31c   :  { %v788_v4 = vpop.xlane.xlu0 %787 }
 0x31d   :  { %v3630_v33 = vadd.f32 %v788_v4, %v171_v19  ;;  %v3775_v19 = vld [vmem:[#allocation17_spill] sm:$0xff] }
 0x31e   :  { %v1776_v4 = vmul.f32 %v1768_v11, %v3775_v19 }
 0x324   :  { %v1780_v18 = vpop.permute.xlu0 %1779 }
 0x325   :  { %v1794_v17 = vmul.f32 %v1780_v18, %v3399_v41  ;;  %v1890_v41 = vmul.f32 %v1876_v37, %v3422_v48  ;;  %v3653_v48 = vld [vmem:[%s3709_s11] ss:$0 sm:$0xff]  ;;  %v3776_v18 = vld [vmem:[#allocation18_spill] sm:$0xff] }
 0x327   :  { %v1798_v29 = vadd.f32 %v1794_v17, %v1774_v59  ;;  %v2229_v17 = vrot.slane %v2228_v8, 1 }
 0x328   :  { %v1784_v14 = vpop.permute.xlu0 %1783 }
 0x329   :  { %v1822_v25 = vadd.f32 %v1818_v27, %v1798_v29  ;;  %v1795_v2 = vmul.f32 %v1784_v14, %v3404_v61  ;;  %v1938_v61 = vmul.f32 %v1924_v9, %v3537_v51  ;;  %v1915_v51 = vmul.f32 %v1904_v35, %v3539_v26 }
 0x32b   :  { %v1846_v21 = vadd.f32 %v1842_v63, %v1822_v25  ;;  %v1799_v53 = vadd.f32 %v1795_v2, %v1775_v13  ;;  %v2230_v13 = vadd.f32 %v2229_v17, %v2228_v8  ;;  %v3781_v8 = vld [vmem:[#allocation25_spill] sm:$0xff] }
 0x32d   :  { %v1870_v55 = vadd.f32 %v1866_v49, %v1846_v21  ;;  %v1808_v62 = vpop.permute.xlu0 %1807  ;;  %v2231_v49 = vmul.f32 0.25, %v2230_v13 }
 0x32e   :  { %v1819_v60 = vmul.f32 %v1808_v62, %v3516_v30  ;;  %v1932_v30 = vpop.permute.xlu1 %1931 }
 0x32f   :  { %v1894_v50 = vadd.f32 %v1890_v41, %v1870_v55  ;;  %v3777_v41 = vld [vmem:[#allocation23_spill] sm:$0xff] }
 0x330   :  { %v1823_v46 = vadd.f32 %v1819_v60, %v1799_v53 }
 0x331   :  { %v1918_v56 = vadd.f32 %v1914_v28, %v1894_v50  ;;  %v2232_v28 = vadd.f32 1e-05, %v2231_v49  ;;  %v2343_v49 = vld [vmem:[%s3719_s21] ss:$0 sm:$0xff] }
 0x332   :  { %v1847_v36 = vadd.f32 %v1843_v1, %v1823_v46  ;;  %v1880_v37 = vpop.permute.xlu0 %1879  ;;  %v1792_v7 = vpop.permute.xlu1 %1791  ;;  %v3778_v1 = vld [vmem:[#allocation24_spill] sm:$0xff] }
 0x333   :  { %v1942_v3 = vadd.f32 %v1938_v61, %v1918_v56  ;;  %v1891_v58 = vmul.f32 %v1880_v37, %v3774_v12  ;;  %2562 = vrsqrt.f32 %v2232_v28  ;;  %v1797_v22 = vmul.f32 %v1792_v7, %v3779_v44  ;;  %v3780_v56 = vld [vmem:[#allocation19_spill] sm:$0xff]  ;;  %v3782_v7 = vld [vmem:[#allocation26_spill] sm:$0xff] }
 0x334   :  { %v1871_v31 = vadd.f32 %v1867_v5, %v1847_v36 }
 0x335   :  { %v1953_v15 = vadd.f32 %v3653_v48, %v1942_v3 }
 0x336   :  { %v1895_v9 = vadd.f32 %v1891_v58, %v1871_v31  ;;  %v1816_v26 = vpop.permute.xlu1 %1815 }
 0x337   :  { %v1957_v39 = vmax.f32 %v1953_v15, 0.0  ;;  %v1788_v0 = vpop.permute.xlu0 %1787  ;;  %v1821_v5 = vmul.f32 %v1816_v26, %v3529_v57 }
 0x338   :  { %v1919_v42 = vadd.f32 %v1915_v51, %v1895_v9  ;;  %v1796_v59 = vmul.f32 %v1788_v0, %v3776_v18 }
 0x339   :  { %v1962_v32 = vrot.slane %v1957_v39, 4 }
 0x33a   :  { %v1943_v27 = vadd.f32 %v1939_v16, %v1919_v42  ;;  %v1800_v29 = vadd.f32 %v1796_v59, %v1776_v4  ;;  %v1840_v62 = vpop.permute.xlu1 %1839 }
 0x33b   :  { %v1964_v23 = vadd.f32 %v1962_v32, %v1957_v39  ;;  %v1845_v3 = vmul.f32 %v1840_v62, %v3531_v45  ;;  %v1940_v39 = vmul.f32 %v1932_v30, %v3551_v34 }
 0x33c   :  { %v1954_v63 = vadd.f32 %v3653_v48, %v1943_v27  ;;  %v1812_v14 = vpop.permute.xlu0 %1811 }
 0x33d   :  { %v1820_v35 = vmul.f32 %v1812_v14, %v3524_v6  ;;  %v2563_v9 = vpop.eup %2562 }
 0x33e   :  { %v1958_v25 = vmax.f32 %v1954_v63, 0.0  ;;  %v1864_v6 = vpop.permute.xlu1 %1863  ;;  %v2234_v45 = vmul.f32 %v2563_v9, %v3632_v38  ;;  %v2342_v38 = vld [vmem:[%s3718_s20] ss:$0 sm:$0xff] }
 0x33f   :  { %v1824_v20 = vadd.f32 %v1820_v35, %v1800_v29  ;;  %v1869_v15 = vmul.f32 %v1864_v6, %v3781_v8 }
 0x340   :  { %v1965_v11 = vadd.f32 %v1964_v23, %v1958_v25  ;;  %v1967_v2 = vrot.slane %v1958_v25, 4 }
 0x341   :  { %v1848_v21 = vadd.f32 %v1844_v40, %v1824_v20  ;;  %v1860_v53 = vpop.permute.xlu0 %1859  ;;  %v2335_v20 = vld [vmem:[%s3710_s12] ss:$0 sm:$0xff] }
 0x342   :  { %v1868_v10 = vmul.f32 %v1860_v53, %v3777_v41  ;;  %v1969_v55 = vadd.f32 %v1967_v2, %v1965_v11  ;;  %v1888_v37 = vpop.permute.xlu1 %1887 }
 0x343   :  { %v1893_v16 = vmul.f32 %v1888_v37, %v3782_v7 }
 0x344   :  { %v1872_v60 = vadd.f32 %v1868_v10, %v1848_v21 }
 0x346   :  { %v1884_v50 = vpop.permute.xlu0 %1883  ;;  %v1936_v57 = vpop.permute.xlu1 %1935 }
 0x347   :  { %v1892_v46 = vmul.f32 %v1884_v50, %v3778_v1  ;;  %v1941_v34 = vmul.f32 %v1936_v57, %v3558_v24 }
 0x349   :  { %v1896_v61 = vadd.f32 %v1892_v46, %v1872_v60 }
 0x34b   :  { %v1772_v52 = vpop.permute.xlu0 %1771 }
 0x34c   :  { %v1777_v54 = vmul.f32 %v1772_v52, %v3780_v56 }
 0x34e   :  { %v1801_v36 = vadd.f32 %v1797_v22, %v1777_v54 }
 0x350   :  { %v1825_v12 = vadd.f32 %v1821_v5, %v1801_v36  ;;  %v1908_v58 = vpop.permute.xlu0 %1907 }
 0x351   :  { %v1916_v31 = vmul.f32 %v1908_v58, %v3548_v43  ;;  %v2341_v43 = vld [vmem:[%s3717_s19] ss:$0 sm:$0xff] }
 0x352   :  { %v1849_v51 = vadd.f32 %v1845_v3, %v1825_v12  ;;  %v2242_v63 = vmul.f32 %v2341_v43, %v2234_v45 }
 0x353   :  { %v1920_v0 = vadd.f32 %v1916_v31, %v1896_v61 }
 0x354   :  { %v1873_v19 = vadd.f32 %v1869_v15, %v1849_v51  ;;  %v1912_v4 = vpop.permute.xlu0 %1911  ;;  %v2250_v25 = vadd.f32 %v2342_v38, %v2242_v63 }
 0x355   :  { %v1944_v42 = vadd.f32 %v1940_v39, %v1920_v0  ;;  %v1917_v18 = vmul.f32 %v1912_v4, %v3555_v47 }
 0x356   :  { %v1897_v59 = vadd.f32 %v1893_v16, %v1873_v19  ;;  %v2251_v2 = vmax.f32 %v2250_v25, 0.0 }
 0x357   :  { %v1955_v17 = vadd.f32 %v3653_v48, %v1944_v42 }
 0x358   :  { %v1921_v30 = vadd.f32 %v1917_v18, %v1897_v59  ;;  %v1388_v32 = vpop.permute.xlu0 %1387  ;;  %v2259_v41 = vmul.f32 %v2343_v49, %v2251_v2 }
 0x359   :  { %v1959_v27 = vmax.f32 %v1955_v17, 0.0  ;;  %v1390_v29 = vsel %vm785_vm5, %v1388_v32, 0.0 }
 0x35a   :  { %v1945_v14 = vadd.f32 %v1941_v34, %v1921_v30  ;;  %1391 = vadd.xlane.f32.xlu1 %v1390_v29 }
 0x35b   :  { %v1970_v47 = vadd.f32 %v1969_v55, %v1959_v27  ;;  %v1972_v13 = vrot.slane %v1959_v27, 4 }
 0x35c   :  { %v1956_v26 = vadd.f32 %v3653_v48, %v1945_v14  ;;  %v2260_v48 = vsel %vm2081_vm4, %v2259_v41, 0.0 }
 0x35d   :  { %v1974_v35 = vadd.f32 %v1972_v13, %v1970_v47 }
 0x35e   :  { %v1960_v23 = vmax.f32 %v1956_v26, 0.0 }
 0x360   :  { %v1975_v24 = vadd.f32 %v1974_v35, %v1960_v23  ;;  %v1977_v40 = vrot.slane %v1960_v23, 4 }
 0x362   :  { %v1979_v11 = vadd.f32 %v1977_v40, %v1975_v24 }
 0x364   :  { %v1987_v21 = vmul.f32 %v2335_v20, %v1979_v11 }
 0x366   :  { %v1988_v53 = vsel %vm785_vm5, %v1987_v21, 0.0 }
 0x367   :  { %1989 = vadd.xlane.f32.xlu0 %v1988_v53 }
 0x36b   :  { %2261 = vadd.xlane.f32.xlu0 %v2260_v48 }
 0x3e7   :  { %v1392_v10 = vpop.xlane.xlu1 %1391 }
 0x3e8   :  { %v1393_v62 = vadd.f32 %v1392_v10, %v3630_v33 }
 0x3f4   :  { %v1990_v55 = vpop.xlane.xlu0 %1989 }
 0x3f5   :  { %v1991_v60 = vadd.f32 %v1990_v55, %v1393_v62 }
 0x3f8   :  { %v2262_v28 = vpop.xlane.xlu0 %2261 }
 0x3f9   :  { %v2263_v50 = vadd.f32 %v2262_v28, %v1991_v60 }
 0x3fb   :  { %v2344_v1 = vmul.f32 -1.442695, %v2263_v50 }
 0x3fd   :  { %2564 = vpow2.f32 %v2344_v1 }
 0x407   :  { %v2565_v46 = vpop.eup %2564 }
 0x408   :  { %v2267_v6 = vadd.f32 1.0, %v2565_v46 }
 0x40a   :  { %2566 = vrcp.f32 %v2267_v6 }
 0x414   :  { %v2567_v61 = vpop.eup %2566 }
 0x415   :  { %2271 = vst.msk [vmem:[%s3720_s22] sm:$0xf] %vm2270_vm6, %v2567_v61 }
 0x416   :  { %2276 = vsyncpa [#allocation4], 1 }
 0x417   :  { %2277 = vsyncpa [#allocation6], 1 }
 0x418   :  { %2278 = vsyncpa [#allocation9], 1 }
 0x419   :  { %2279 = vsyncpa [#allocation12], 1 }

</bundles_post_ra>
